<compile_context>
chip_gen: v7x
topology: tpu7x:2x2x1
jax: 0.10.0
libtpu: 0.0.40
codegen_flags: <defaults>
</compile_context>

<pallas_src>
import functools

import jax
import jax.numpy as jnp
from jax.experimental import pallas as pl
from jax.experimental.pallas import tpu as pltpu


def _choose_tile_and_vmem(hw_pad, batch, channels, needs_resize, src_hw,
                          itemsize, c_total):
    """Largest multiple-of-128 divisor of hw_pad (<=2048) whose per-step block
    footprint fits a conservative VMEM budget, plus a matching vmem limit."""
    resident = 0
    max_k = 0
    copy_c = 0
    n_resized = 0
    for c, rs, k in zip(channels, needs_resize, src_hw):
        if rs:
            resident += 2 * batch * c * k * itemsize   # whole slab, double-buffered
            max_k = max(max_k, k)
            n_resized += 1
        else:
            copy_c += c

    def footprint(tile):
        f = resident
        f += 2 * batch * copy_c * tile * itemsize      # copy-path input tiles
        f += 2 * batch * c_total * tile * itemsize     # output tiles
        f += 2 * max(n_resized, 1) * tile * 4          # src-index rows (tiny)
        f += max_k * tile * 8                          # in-kernel iota + one-hot tmp
        f += batch * c_total * tile * 4                # f32 matmul results / misc
        return f

    budget = 40 * 1024 * 1024                          # safe on v7x's 64 MiB VMEM
    best = 128
    t = 128
    while t <= min(hw_pad, 2048):
        if hw_pad % t == 0 and footprint(t) <= budget:
            best = t
        t += 128
    vmem = int(min(max(footprint(best) * 1.25 + (4 << 20), 32 << 20), 56 << 20))
    return best, vmem


def _interpolate_concat_kernel(*refs, channels, needs_resize, src_hw, hw_tile,
                               compute_dtype, precision):
    """refs = (x_0, ..., x_{n-1}[, src_idx], out).

    x_i (copy path)   : (B, C_i, hw_tile) block already at target size.
    x_i (resize path) : (B, C_i, Hi*Wi) whole-slab block (VMEM resident).
    src_idx           : (n_resized, hw_tile) int32 nearest-source flat indices.
    out               : (B, C_total, hw_tile) block.
    """
    n = len(channels)
    has_resize = any(needs_resize)
    x_refs = refs[:n]
    if has_resize:
        src_ref = refs[n]
        out_ref = refs[n + 1]
    else:
        out_ref = refs[n]
    batch = out_ref.shape[0]

    row = 0   # row inside src_ref
    off = 0   # channel offset inside out
    for x_ref, c, resize, k in zip(x_refs, channels, needs_resize, src_hw):
        if resize:
            flat_src = src_ref[row:row + 1, :]                       # (1, hw_tile) i32
            row += 1
            k_iota = jax.lax.broadcasted_iota(jnp.int32, (k, hw_tile), 0)
            # One-hot selection built on the VPU (no HBM traffic); exactly one
            # 1.0 per output column -> the MXU matmul is a gather.
            sel = (k_iota == flat_src).astype(compute_dtype)         # (K, hw_tile)
            for b in range(batch):                                   # static unroll
                xb = x_ref[b].astype(compute_dtype)                  # (C_i, K)
                yb = jnp.dot(xb, sel,
                             preferred_element_type=jnp.float32,
                             precision=precision)
                out_ref[b, off:off + c, :] = yb.astype(out_ref.dtype)
        else:
            # Already at (H, W): straight lane-dense slab copy.
            out_ref[:, off:off + c, :] = x_ref[...]
        off += c


def interpolate_concat(inputs, dim: int = 1):
    """Pallas implementation of InterpolateConcat.forward for NCHW arrays."""
    assert dim == 1, "Kernel implements the default dim=1 (channel) semantics."
    assert len(inputs) >= 1
    batch = inputs[0].shape[0]
    dtype = inputs[0].dtype
    shapes = [tuple(x.shape) for x in inputs]
    for x in inputs:
        assert x.ndim == 4 and x.shape[0] == batch and x.dtype == dtype

    H = max(s[2] for s in shapes)
    W = max(s[3] for s in shapes)
    HW = H * W
    HW_pad = ((HW + 127) // 128) * 128           # lane-dense padded spatial axis
    channels = tuple(s[1] for s in shapes)
    C_total = sum(channels)
    needs_resize = tuple((s[2] != H) or (s[3] != W) for s in shapes)
    src_hw = tuple(s[2] * s[3] for s in shapes)
    itemsize = jnp.dtype(dtype).itemsize

    hw_tile, vmem_bytes = _choose_tile_and_vmem(
        HW_pad, batch, channels, needs_resize, src_hw, itemsize, C_total)
    num_tiles = HW_pad // hw_tile

    # --- Operands + input specs. ---
    operands = []
    in_specs = []
    for x, s, rs in zip(inputs, shapes, needs_resize):
        Ci, Hi, Wi = s[1], s[2], s[3]
        if rs:
            # Whole (B, C_i, Hi*Wi) slab; constant block index -> DMA'd once,
            # stays VMEM-resident across all hw tiles.
            operands.append(x.reshape(batch, Ci, Hi * Wi))
            in_specs.append(pl.BlockSpec((batch, Ci, Hi * Wi),
                                         lambda t: (0, 0, 0)))
        else:
            xf = x.reshape(batch, Ci, HW)
            if HW_pad != HW:
                xf = jnp.pad(xf, ((0, 0), (0, 0), (0, HW_pad - HW)))
            operands.append(xf)
            in_specs.append(pl.BlockSpec((batch, Ci, hw_tile),
                                         lambda t: (0, 0, t)))

    # --- Nearest-neighbour source-index vectors (PyTorch 'nearest':
    #     src = floor(dst * in / out)), one tiny int32 row per resized input. ---
    src_rows = []
    for s, rs in zip(shapes, needs_resize):
        if not rs:
            continue
        Hi, Wi = s[2], s[3]
        row_src = (jnp.arange(H, dtype=jnp.int32) * Hi) // H
        col_src = (jnp.arange(W, dtype=jnp.int32) * Wi) // W
        flat_src = (row_src[:, None] * Wi + col_src[None, :]).reshape(HW)
        if HW_pad != HW:
            flat_src = jnp.pad(flat_src, (0, HW_pad - HW), constant_values=-1)
        src_rows.append(flat_src)
    if src_rows:
        operands.append(jnp.stack(src_rows, axis=0))          # (n_resized, HW_pad)
        in_specs.append(pl.BlockSpec((len(src_rows), hw_tile),
                                     lambda t: (0, t)))

    out_spec = pl.BlockSpec((batch, C_total, hw_tile), lambda t: (0, 0, t))

    # bf16 inputs: single-pass bf16 MXU matmul (0/1 sel exact in bf16).
    # f32 inputs: HIGHEST keeps the one-hot gather effectively exact.
    if dtype == jnp.bfloat16:
        compute_dtype = jnp.bfloat16
        precision = jax.lax.Precision.DEFAULT
    else:
        compute_dtype = jnp.float32
        precision = jax.lax.Precision.HIGHEST

    kernel = functools.partial(
        _interpolate_concat_kernel,
        channels=channels, needs_resize=needs_resize, src_hw=src_hw,
        hw_tile=hw_tile, compute_dtype=compute_dtype, precision=precision)

    out_flat = pl.pallas_call(
        kernel,
        out_shape=jax.ShapeDtypeStruct((batch, C_total, HW_pad), dtype),
        grid=(num_tiles,),
        in_specs=in_specs,
        out_specs=out_spec,
        compiler_params=pltpu.CompilerParams(
            dimension_semantics=("parallel",),
            vmem_limit_bytes=vmem_bytes),
    )(*operands)

    if HW_pad != HW:
        out_flat = out_flat[:, :, :HW]
    return out_flat.reshape(batch, C_total, H, W)


def _interpolate_concat_ref(inputs, dim: int = 1):
    """Pure-JAX reference mirroring the PyTorch forward (mode='nearest')."""
    H = max(x.shape[2] for x in inputs)
    W = max(x.shape[3] for x in inputs)
    ys = []
    for x in inputs:
        _, _, Hi, Wi = x.shape
        if Hi != H or Wi != W:
            row = (jnp.arange(H, dtype=jnp.int32) * Hi) // H
            col = (jnp.arange(W, dtype=jnp.int32) * Wi) // W
            x = jnp.take(jnp.take(x, row, axis=2), col, axis=3)
        ys.append(x)
    return jnp.concatenate(ys, axis=dim)


if __name__ == "__main__":
    key = jax.random.PRNGKey(0)
    k1, k2, k3 = jax.random.split(key, 3)

    # Three feature maps with mismatched spatial sizes (as the module expects).
    x1 = jax.random.normal(k1, (2, 4, 16, 16), dtype=jnp.float32)  # already max size
    x2 = jax.random.normal(k2, (2, 6, 8, 8), dtype=jnp.float32)    # upsampled 2x in H and W
    x3 = jax.random.normal(k3, (2, 3, 16, 8), dtype=jnp.float32)   # upsampled 2x in W only

    out = interpolate_concat([x1, x2, x3])
    jax.block_until_ready(out)

    expected = _interpolate_concat_ref([x1, x2, x3])
    assert out.shape == expected.shape, (out.shape, expected.shape)
    assert jnp.allclose(out, expected, rtol=1e-4, atol=1e-4), \
        "Pallas InterpolateConcat mismatch vs reference"

    print("KERNEL_OK")
</pallas_src>

<mosaic_0001>
module attributes {stable_mosaic.version = 11 : i64} {
  func.func @_interpolate_concat_kernel(%arg0: i32, %arg1: memref<2x4x256xf32, #tpu.memory_space<vmem>>, %arg2: memref<2x6x64xf32, #tpu.memory_space<vmem>>, %arg3: memref<2x3x128xf32, #tpu.memory_space<vmem>>, %arg4: memref<2x256xi32, #tpu.memory_space<vmem>>, %arg5: memref<2x13x256xf32, #tpu.memory_space<vmem>>) attributes {dimension_semantics = [#tpu.dimension_semantics<parallel>], iteration_bounds = array<i64: 1>, scalar_prefetch = 0 : i64, scratch_operands = 0 : i64, tpu.core_type = #tpu.core_type<tc>, window_params = [{transform_indices = @transform_0, window_bounds = array<i64: 2, 4, 256>}, {pipeline_mode = #tpu.pipeline_mode<synchronous>, transform_indices = @transform_1, window_bounds = array<i64: 2, 6, 64>}, {pipeline_mode = #tpu.pipeline_mode<synchronous>, transform_indices = @transform_2, window_bounds = array<i64: 2, 3, 128>}, {transform_indices = @transform_3, window_bounds = array<i64: 2, 256>}, {transform_indices = @transform_4, window_bounds = array<i64: 2, 13, 256>}]} {
    %c0 = arith.constant 0 : index
    %c0_0 = arith.constant 0 : index
    %c0_1 = arith.constant 0 : index
    %0 = vector.load %arg1[%c0, %c0_0, %c0_1] : memref<2x4x256xf32, #tpu.memory_space<vmem>>, vector<2x4x256xf32>
    %c0_2 = arith.constant 0 : index
    %c0_3 = arith.constant 0 : index
    %c0_4 = arith.constant 0 : index
    %1 = vector.load %arg5[%c0_2, %c0_3, %c0_4] : memref<2x13x256xf32, #tpu.memory_space<vmem>>, vector<2x4x256xf32>
    tpu.vector_store %arg5[%c0_2, %c0_3, %c0_4], %0 {strides = array<i32>} : memref<2x13x256xf32, #tpu.memory_space<vmem>>, vector<2x4x256xf32>,
    %c0_5 = arith.constant 0 : index
    %c0_6 = arith.constant 0 : index
    %2 = vector.load %arg4[%c0_5, %c0_6] : memref<2x256xi32, #tpu.memory_space<vmem>>, vector<1x256xi32>
    %3 = tpu.iota {dimensions = array<i32: 0>} : vector<64x256xi32>
    %4 = vector.broadcast %2 : vector<1x256xi32> to vector<64x256xi32>
    %5 = arith.cmpi eq, %3, %4 : vector<64x256xi32>
    %6 = arith.extui %5 : vector<64x256xi1> to vector<64x256xi32>
    %7 = arith.sitofp %6 : vector<64x256xi32> to vector<64x256xf32>
    %c0_7 = arith.constant 0 : index
    %c0_8 = arith.constant 0 : index
    %c0_9 = arith.constant 0 : index
    %8 = vector.load %arg2[%c0_7, %c0_8, %c0_9] : memref<2x6x64xf32, #tpu.memory_space<vmem>>, vector<1x6x64xf32>
    %9 = vector.shape_cast %8 : vector<1x6x64xf32> to vector<6x64xf32>
    %cst = arith.constant dense<0.000000e+00> : vector<6x256xf32>
    %10 = tpu.matmul %9, %7, %cst {dimension_numbers = #tpu.dot_dimension_numbers<[1], [0], [0], [1], [0, 0, 1, 1], [], []>, precision = #tpu.contract_precision<fp32>} : vector<6x64xf32>, vector<64x256xf32>, vector<6x256xf32> -> vector<6x256xf32>
    %c0_10 = arith.constant 0 : index
    %c4 = arith.constant 4 : index
    %c0_11 = arith.constant 0 : index
    %11 = vector.load %arg5[%c0_10, %c4, %c0_11] : memref<2x13x256xf32, #tpu.memory_space<vmem>>, vector<1x6x256xf32>
    %12 = vector.shape_cast %11 : vector<1x6x256xf32> to vector<6x256xf32>
    %13 = vector.shape_cast %10 : vector<6x256xf32> to vector<1x6x256xf32>
    tpu.vector_store %arg5[%c0_10, %c4, %c0_11], %13 {strides = array<i32>} : memref<2x13x256xf32, #tpu.memory_space<vmem>>, vector<1x6x256xf32>,
    %c1 = arith.constant 1 : index
    %c0_12 = arith.constant 0 : index
    %c0_13 = arith.constant 0 : index
    %14 = vector.load %arg2[%c1, %c0_12, %c0_13] : memref<2x6x64xf32, #tpu.memory_space<vmem>>, vector<1x6x64xf32>
    %15 = vector.shape_cast %14 : vector<1x6x64xf32> to vector<6x64xf32>
    %cst_14 = arith.constant dense<0.000000e+00> : vector<6x256xf32>
    %16 = tpu.matmul %15, %7, %cst_14 {dimension_numbers = #tpu.dot_dimension_numbers<[1], [0], [0], [1], [0, 0, 1, 1], [], []>, precision = #tpu.contract_precision<fp32>} : vector<6x64xf32>, vector<64x256xf32>, vector<6x256xf32> -> vector<6x256xf32>
    %c1_15 = arith.constant 1 : index
    %c4_16 = arith.constant 4 : index
    %c0_17 = arith.constant 0 : index
    %17 = vector.load %arg5[%c1_15, %c4_16, %c0_17] : memref<2x13x256xf32, #tpu.memory_space<vmem>>, vector<1x6x256xf32>
    %18 = vector.shape_cast %17 : vector<1x6x256xf32> to vector<6x256xf32>
    %19 = vector.shape_cast %16 : vector<6x256xf32> to vector<1x6x256xf32>
    tpu.vector_store %arg5[%c1_15, %c4_16, %c0_17], %19 {strides = array<i32>} : memref<2x13x256xf32, #tpu.memory_space<vmem>>, vector<1x6x256xf32>,
    %c1_18 = arith.constant 1 : index
    %c0_19 = arith.constant 0 : index
    %20 = vector.load %arg4[%c1_18, %c0_19] : memref<2x256xi32, #tpu.memory_space<vmem>>, vector<1x256xi32>
    %21 = tpu.iota {dimensions = array<i32: 0>} : vector<128x256xi32>
    %22 = vector.broadcast %20 : vector<1x256xi32> to vector<128x256xi32>
    %23 = arith.cmpi eq, %21, %22 : vector<128x256xi32>
    %24 = arith.extui %23 : vector<128x256xi1> to vector<128x256xi32>
    %25 = arith.sitofp %24 : vector<128x256xi32> to vector<128x256xf32>
    %c0_20 = arith.constant 0 : index
    %c0_21 = arith.constant 0 : index
    %c0_22 = arith.constant 0 : index
    %26 = vector.load %arg3[%c0_20, %c0_21, %c0_22] : memref<2x3x128xf32, #tpu.memory_space<vmem>>, vector<1x3x128xf32>
    %27 = vector.shape_cast %26 : vector<1x3x128xf32> to vector<3x128xf32>
    %cst_23 = arith.constant dense<0.000000e+00> : vector<3x256xf32>
    %28 = tpu.matmul %27, %25, %cst_23 {dimension_numbers = #tpu.dot_dimension_numbers<[1], [0], [0], [1], [0, 0, 1, 1], [], []>, precision = #tpu.contract_precision<fp32>} : vector<3x128xf32>, vector<128x256xf32>, vector<3x256xf32> -> vector<3x256xf32>
    %c0_24 = arith.constant 0 : index
    %c10 = arith.constant 10 : index
    %c0_25 = arith.constant 0 : index
    %29 = vector.load %arg5[%c0_24, %c10, %c0_25] : memref<2x13x256xf32, #tpu.memory_space<vmem>>, vector<1x3x256xf32>
    %30 = vector.shape_cast %29 : vector<1x3x256xf32> to vector<3x256xf32>
    %31 = vector.shape_cast %28 : vector<3x256xf32> to vector<1x3x256xf32>
    tpu.vector_store %arg5[%c0_24, %c10, %c0_25], %31 {strides = array<i32>} : memref<2x13x256xf32, #tpu.memory_space<vmem>>, vector<1x3x256xf32>,
    %c1_26 = arith.constant 1 : index
    %c0_27 = arith.constant 0 : index
    %c0_28 = arith.constant 0 : index
    %32 = vector.load %arg3[%c1_26, %c0_27, %c0_28] : memref<2x3x128xf32, #tpu.memory_space<vmem>>, vector<1x3x128xf32>
    %33 = vector.shape_cast %32 : vector<1x3x128xf32> to vector<3x128xf32>
    %cst_29 = arith.constant dense<0.000000e+00> : vector<3x256xf32>
    %34 = tpu.matmul %33, %25, %cst_29 {dimension_numbers = #tpu.dot_dimension_numbers<[1], [0], [0], [1], [0, 0, 1, 1], [], []>, precision = #tpu.contract_precision<fp32>} : vector<3x128xf32>, vector<128x256xf32>, vector<3x256xf32> -> vector<3x256xf32>
    %c1_30 = arith.constant 1 : index
    %c10_31 = arith.constant 10 : index
    %c0_32 = arith.constant 0 : index
    %35 = vector.load %arg5[%c1_30, %c10_31, %c0_32] : memref<2x13x256xf32, #tpu.memory_space<vmem>>, vector<1x3x256xf32>
    %36 = vector.shape_cast %35 : vector<1x3x256xf32> to vector<3x256xf32>
    %37 = vector.shape_cast %34 : vector<3x256xf32> to vector<1x3x256xf32>
    tpu.vector_store %arg5[%c1_30, %c10_31, %c0_32], %37 {strides = array<i32>} : memref<2x13x256xf32, #tpu.memory_space<vmem>>, vector<1x3x256xf32>,
    return
  }
  func.func @transform_0(%arg0: i32) -> (i32, i32, i32) {
    %c0_i32 = arith.constant 0 : i32
    %c0_i32_0 = arith.constant 0 : i32
    %c0_i32_1 = arith.constant 0 : i32
    return %c0_i32, %c0_i32_0, %arg0 : i32, i32, i32
  }
  func.func @transform_1(%arg0: i32) -> (i32, i32, i32) {
    %c0_i32 = arith.constant 0 : i32
    %c0_i32_0 = arith.constant 0 : i32
    %c0_i32_1 = arith.constant 0 : i32
    %c0_i32_2 = arith.constant 0 : i32
    return %c0_i32, %c0_i32_0, %c0_i32_1 : i32, i32, i32
  }
  func.func @transform_2(%arg0: i32) -> (i32, i32, i32) {
    %c0_i32 = arith.constant 0 : i32
    %c0_i32_0 = arith.constant 0 : i32
    %c0_i32_1 = arith.constant 0 : i32
    %c0_i32_2 = arith.constant 0 : i32
    return %c0_i32, %c0_i32_0, %c0_i32_1 : i32, i32, i32
  }
  func.func @transform_3(%arg0: i32) -> (i32, i32) {
    %c0_i32 = arith.constant 0 : i32
    %c0_i32_0 = arith.constant 0 : i32
    return %c0_i32, %arg0 : i32, i32
  }
  func.func @transform_4(%arg0: i32) -> (i32, i32, i32) {
    %c0_i32 = arith.constant 0 : i32
    %c0_i32_0 = arith.constant 0 : i32
    %c0_i32_1 = arith.constant 0 : i32
    return %c0_i32, %c0_i32_0, %arg0 : i32, i32, i32
  }
}

</mosaic_0001>

<bundles_post_ra>
// kernel: tpu_custom_call.1
= control target key start
LH: loop header
LB: loop body
LE: loop exit
PB: predicated region body
PF: predicated region fallthrough
CT: control target
= control target key end

     0   :  { %v30_v0 = vlaneseq  ;;  %v5953_v1 = vmov 0.0   ;;  %vm96_vm0 = vcmask 523264   ;;  %v5925_v27 = vmov 1.0|1.0   ;;  %s5920_s3 = inlined_call_operand.vmem [shape: s32[2,256], index: 3, kind: input, shape index: {}]   ;;  %s5921_s1 = inlined_call_operand.vmem [shape: f32[2,6,64], index: 1, kind: input, shape index: {}]   ;;  %s5922_s2 = inlined_call_operand.vmem [shape: f32[2,3,128], index: 2, kind: input, shape index: {}]   ;;  %s5923_s0 = inlined_call_operand.vmem [shape: f32[2,4,256], index: 0, kind: input, shape index: {}]   ;;  %s5924_s4 = inlined_call_operand.vmem [shape: f32[2,13,256], index: 4, kind: output, shape index: {}]  }
   0x1   :  { %180 = vmatprep.mubr.f32.mxu0 %v5953_v1  ;;  %842 = vmatprep.mubr.f32.mxu1 %v5953_v1  ;;  %v95_v3 = vld [vmem:[%s5921_s1] sm:$0x3f]  ;;  %v3331_v4 = vld [vmem:[%s5921_s1 + $0x8] sm:$0x3f]  ;;  %v6052_v30 = vmov 0  ;;  %v6055_v37 = vmov 0 }
   0x2   :  { %v4261_v2 = vshrl.u32 %v30_v0, 7  ;;  %v29_v5 = vld [vmem:[%s5920_s3] ss:$2 sm:$0x3]  ;;  %v4286_v12 = vsel %vm96_vm0, %v95_v3, 0  ;;  %v4288_v13 = vsel %vm96_vm0, %v3331_v4, 0 }
   0x3   :  { %v3384_v6 = vld [vmem:[%s5920_s3 + $0x1] ss:$2 sm:$0x3]  ;;  %v4343_v32 = vand.u32 4294901760, %v4286_v12  ;;  %v4358_v34 = vand.u32 4294901760, %v4288_v13  ;;  %v6058_v42 = vmov 0 }
   0x4   :  { %v4276_v7 = vadd.s32 8, %v4261_v2  ;;  %v45_v8 = vsub.s32 1, %v4261_v2  ;;  %v41_v9 = vsub.s32 0, %v4261_v2  ;;  %v4281_v10 = vadd.s32 16, %v4261_v2 }
   0x5   :  { %v4284_v11 = vadd.s32 24, %v4261_v2  ;;  %v4299_v18 = vadd.s32 32, %v4261_v2  ;;  %v4302_v19 = vadd.s32 40, %v4261_v2  ;;  %v4305_v20 = vadd.s32 48, %v4261_v2 }
   0x6   :  { %v4290_v14 = vrot.slane %v29_v5, %v45_v8  ;;  %v4292_v15 = vrot.slane %v3384_v6, %v45_v8  ;;  %v4294_v16 = vrot.slane %v29_v5, %v41_v9  ;;  %v4296_v17 = vrot.slane %v3384_v6, %v41_v9 }
   0x7   :  { %v4308_v21 = vadd.s32 56, %v4261_v2  ;;  %v6061_v47 = vmov 0  ;;  %v6066_v57 = vmov 0  ;;  %v4474_v5 = vsub.f32 %v4286_v12, %v4343_v32 }
   0x8   :  { %vm48_vm1 = vcmp.eq.s32.totalorder %v4261_v2, %v4290_v14  ;;  %vm50_vm2 = vcmp.eq.s32.totalorder %v4276_v7, %v4290_v14  ;;  %vm47_vm3 = vcmp.eq.s32.totalorder %v4261_v2, %v4294_v16  ;;  %vm49_vm4 = vcmp.eq.s32.totalorder %v4276_v7, %v4294_v16 }
   0x9   :  { %v3268_v22 = vsel %vm48_vm1, 1.0, %v5953_v1  ;;  %v3270_v23 = vsel %vm50_vm2, 1.0, %v5953_v1  ;;  %vm4320_vm5 = vmpackc.low %vm50_vm2, %vm48_vm1  ;;  %v3267_v25 = vsel %vm47_vm3, 1.0, %v5953_v1  ;;  %v3269_v26 = vsel %vm49_vm4, 1.0, %v5953_v1 }
   0xa   :  { %3613 = vmatprep.subr.msk.bf16.mxu0 %vm4320_vm5, %v5925_v27  ;;  %v4329_v28 = vsub.f32 %v3268_v22, %v3268_v22  ;;  %v4331_v29 = vsub.f32 %v3270_v23, %v3270_v23  ;;  %3709 = vmatprep.subr.msk.bf16.mxu1 %vm4320_vm5, %v5925_v27  ;;  %vm4336_vm6 = vmpackc.low %vm49_vm4, %vm47_vm3  ;;  %v4340_v31 = vsub.f32 %v3267_v25, %v3267_v25 }
   0xb   :  { %v6053_v30 = vsel %vm4336_vm6, 4294967295, %v6052_v30  ;;  %3615 = vmatpush1.bf16.msk.msra.mxu0 %vm4336_vm6, %v5925_v27  ;;  %v4348_v33 = vsub.f32 %v3269_v26, %v3269_v26  ;;  %3711 = vmatpush1.bf16.msk.msra.mxu1 %vm4336_vm6, %v5925_v27  ;;  %vm52_vm7 = vcmp.eq.s32.totalorder %v4281_v10, %v4290_v14  ;;  %vm54_vm8 = vcmp.eq.s32.totalorder %v4284_v11, %v4290_v14 }
   0xc   :  { %6054 = vst [vmem:[#allocation2_spill] sm:$0xff] %v6053_v30  ;;  %v3272_v35 = vsel %vm52_vm7, 1.0, %v5953_v1  ;;  %v3274_v36 = vsel %vm54_vm8, 1.0, %v5953_v1  ;;  %vm4362_vm9 = vmpackc.low %vm54_vm8, %vm52_vm7  ;;  %vm51_vm10 = vcmp.eq.s32.totalorder %v4281_v10, %v4294_v16  ;;  %vm53_vm11 = vcmp.eq.s32.totalorder %v4284_v11, %v4294_v16 }
   0xd   :  { %v6056_v37 = vsel %vm4362_vm9, 4294967295, %v6055_v37  ;;  %3617 = vmatprep.subr.msk.bf16.mxu0 %vm4362_vm9, %v5925_v27  ;;  %v4373_v38 = vsub.f32 %v3272_v35, %v3272_v35  ;;  %v4375_v39 = vsub.f32 %v3274_v36, %v3274_v36  ;;  %3713 = vmatprep.subr.msk.bf16.mxu1 %vm4362_vm9, %v5925_v27  ;;  %v3271_v40 = vsel %vm51_vm10, 1.0, %v5953_v1  ;;  %vm4382_vm12 = vmpackc.low %vm53_vm11, %vm51_vm10 }
   0xe   :  { %6057 = vst [vmem:[#allocation3_spill] sm:$0xff] %v6056_v37  ;;  %v3273_v41 = vsel %vm53_vm11, 1.0, %v5953_v1  ;;  %v6059_v42 = vsel %vm4382_vm12, 4294967295, %v6058_v42  ;;  %v4386_v43 = vsub.f32 %v3271_v40, %v3271_v40  ;;  %vm56_vm13 = vcmp.eq.s32.totalorder %v4299_v18, %v4290_v14 }
   0xf   :  { %6060 = vst [vmem:[#allocation4_spill] sm:$0xff] %v6059_v42  ;;  %v4388_v44 = vsub.f32 %v3273_v41, %v3273_v41  ;;  %vm58_vm14 = vcmp.eq.s32.totalorder %v4302_v19, %v4290_v14  ;;  %3619 = vmatpush1.bf16.msk.msra.mxu0 %vm4382_vm12, %v5925_v27  ;;  %3715 = vmatpush1.bf16.msk.msra.mxu1 %vm4382_vm12, %v5925_v27  ;;  %v3276_v45 = vsel %vm56_vm13, 1.0, %v5953_v1  ;;  %v194_v3 = vand.u32 4294901760, %v4329_v28 }
  0x10   :  { %v3278_v46 = vsel %vm58_vm14, 1.0, %v5953_v1  ;;  %vm4402_vm15 = vmpackc.low %vm58_vm14, %vm56_vm13  ;;  %vm55_vm0 = vcmp.eq.s32.totalorder %v4299_v18, %v4294_v16  ;;  %vm57_vm1 = vcmp.eq.s32.totalorder %v4302_v19, %v4294_v16  ;;  %v4413_v48 = vsub.f32 %v3276_v45, %v3276_v45 }
  0x11   :  { %v6062_v47 = vsel %vm4402_vm15, 4294967295, %v6061_v47  ;;  %3621 = vmatprep.subr.msk.bf16.mxu0 %vm4402_vm15, %v5925_v27  ;;  %v4415_v49 = vsub.f32 %v3278_v46, %v3278_v46  ;;  %3717 = vmatprep.subr.msk.bf16.mxu1 %vm4402_vm15, %v5925_v27  ;;  %v3275_v50 = vsel %vm55_vm0, 1.0, %v5953_v1  ;;  %v3277_v51 = vsel %vm57_vm1, 1.0, %v5953_v1  ;;  %vm4422_vm2 = vmpackc.low %vm57_vm1, %vm55_vm0 }
  0x12   :  { %6063 = vst [vmem:[#allocation5_spill] sm:$0xff] %v6062_v47  ;;  %v4426_v53 = vsub.f32 %v3275_v50, %v3275_v50  ;;  %v4428_v54 = vsub.f32 %v3277_v51, %v3277_v51  ;;  %vm60_vm3 = vcmp.eq.s32.totalorder %v4305_v20, %v4290_v14  ;;  %vm62_vm4 = vcmp.eq.s32.totalorder %v4308_v21, %v4290_v14 }
  0x13   :  { %v3280_v55 = vsel %vm60_vm3, 1.0, %v5953_v1  ;;  %v3282_v56 = vsel %vm62_vm4, 1.0, %v5953_v1  ;;  %vm4436_vm7 = vmpackc.low %vm62_vm4, %vm60_vm3  ;;  %vm59_vm8 = vcmp.eq.s32.totalorder %v4305_v20, %v4294_v16  ;;  %vm61_vm10 = vcmp.eq.s32.totalorder %v4308_v21, %v4294_v16  ;;  %3623 = vmatpush1.bf16.msk.msra.mxu0 %vm4422_vm2, %v5925_v27  ;;  %3719 = vmatpush1.bf16.msk.msra.mxu1 %vm4422_vm2, %v5925_v27 }
  0x14   :  { %v6067_v57 = vsel %vm4436_vm7, 4294967295, %v6066_v57  ;;  %v4450_v58 = vsub.f32 %v3280_v55, %v3280_v55  ;;  %v4452_v59 = vsub.f32 %v3282_v56, %v3282_v56  ;;  %v3279_v60 = vsel %vm59_vm8, 1.0, %v5953_v1  ;;  %3625 = vmatprep.subr.msk.bf16.mxu0 %vm4436_vm7, %v5925_v27  ;;  %3721 = vmatprep.subr.msk.bf16.mxu1 %vm4436_vm7, %v5925_v27  ;;  %vm4462_vm11 = vmpackc.low %vm61_vm10, %vm59_vm8 }
  0x15   :  { %6068 = vst [vmem:[#allocation6_spill] sm:$0xff] %v6067_v57  ;;  %v3281_v61 = vsel %vm61_vm10, 1.0, %v5953_v1  ;;  %v4466_v63 = vsub.f32 %v3279_v60, %v3279_v60  ;;  %v206_v4 = vand.u32 4294901760, %v4331_v29  ;;  %v200_v6 = vand.u32 4294901760, %v4340_v31 }
  0x16   :  { %v4468_v0 = vsub.f32 %v3281_v61, %v3281_v61  ;;  %v212_v8 = vand.u32 4294901760, %v4348_v33  ;;  %v4480_v9 = vsub.f32 %v4288_v13, %v4358_v34  ;;  %v195_v14 = vsub.f32 %v4329_v28, %v194_v3 }
  0x17   :  { %v207_v16 = vsub.f32 %v4331_v29, %v206_v4  ;;  %v5928_v22 = vand.u32 4294901760, %v4373_v38  ;;  %v5927_v12 = vand.u32 4294901760, %v4375_v39  ;;  %3627 = vmatpush1.bf16.msk.msra.mxu0 %vm4462_vm11, %v5925_v27  ;;  %3723 = vmatpush1.bf16.msk.msra.mxu1 %vm4462_vm11, %v5925_v27  ;;  %v5930_v13 = vand.u32 4294901760, %v4474_v5 }
  0x18   :  { %v201_v23 = vsub.f32 %v4340_v31, %v200_v6  ;;  %v213_v25 = vsub.f32 %v4348_v33, %v212_v8  ;;  %v5929_v26 = vand.u32 4294901760, %v4480_v9  ;;  %v196_v35 = vand.u32 4294901760, %v195_v14 }
  0x19   :  { %v208_v36 = vand.u32 4294901760, %v207_v16  ;;  %v219_v40 = vsub.f32 %v4373_v38, %v5928_v22  ;;  %v231_v41 = vsub.f32 %v4375_v39, %v5927_v12  ;;  %v184_v45 = vsub.f32 %v4474_v5, %v5930_v13 }
  0x1a   :  { %v202_v46 = vand.u32 4294901760, %v201_v23  ;;  %v214_v50 = vand.u32 4294901760, %v213_v25  ;;  %v846_v51 = vsub.f32 %v4480_v9, %v5929_v26  ;;  %v224_v61 = vand.u32 4294901760, %v4386_v43 }
  0x1b   :  { %v3628_v55 = vpack.c.bf16 %v208_v36, %v196_v35  ;;  %v220_v56 = vand.u32 4294901760, %v219_v40  ;;  %v232_v60 = vand.u32 4294901760, %v231_v41  ;;  %v185_v14 = vand.u32 4294901760, %v184_v45 }
  0x1c   :  { %v3630_v16 = vpack.c.bf16 %v214_v50, %v202_v46  ;;  %v847_v27 = vand.u32 4294901760, %v846_v51  ;;  %v5937_v12 = vand.u32 4294901760, %v4388_v44  ;;  %v225_v23 = vsub.f32 %v4386_v43, %v224_v61 }
  0x1d   :  { %3629 = vmatprep.subr.bf16.mxu0 %v3628_v55  ;;  %3725 = vmatprep.subr.bf16.mxu1 %v3628_v55  ;;  %v3632_v22 = vpack.c.bf16 %v232_v60, %v220_v56  ;;  %v5934_v25 = vand.u32 4294901760, %v4413_v48  ;;  %v5933_v35 = vand.u32 4294901760, %v4415_v49  ;;  %v5931_v40 = vand.u32 4294901760, %v4426_v53 }
  0x1e   :  { %186 = vmatmul.mubr.f32.vlgmr.msra.gmra.mrb[0].mxu0 %v185_v14  ;;  %848 = vmatmul.mubr.f32.vlgmr.msra.gmra.mrb[0].mxu1 %v847_v27  ;;  %v237_v36 = vsub.f32 %v4388_v44, %v5937_v12  ;;  %v5932_v41 = vand.u32 4294901760, %v4428_v54  ;;  %v5936_v45 = vand.u32 4294901760, %v4450_v58  ;;  %v226_v46 = vand.u32 4294901760, %v225_v23 }
  0x1f   :  { %3631 = vmatpush1.bf16.msra.mxu0 %v3630_v16  ;;  %3727 = vmatpush1.bf16.msra.mxu1 %v3630_v16  ;;  %v243_v50 = vsub.f32 %v4413_v48, %v5934_v25  ;;  %v255_v27 = vsub.f32 %v4415_v49, %v5933_v35  ;;  %v5935_v51 = vand.u32 4294901760, %v4452_v59  ;;  %v249_v56 = vsub.f32 %v4426_v53, %v5931_v40 }
  0x20   :  { %3633 = vmatprep.subr.bf16.mxu0 %v3632_v22  ;;  %3729 = vmatprep.subr.bf16.mxu1 %v3632_v22  ;;  %v238_v55 = vand.u32 4294901760, %v237_v36  ;;  %v261_v60 = vsub.f32 %v4428_v54, %v5932_v41  ;;  %v267_v14 = vsub.f32 %v4450_v58, %v5936_v45  ;;  %v272_v22 = vand.u32 4294901760, %v4466_v63 }
  0x21   :  { %v244_v16 = vand.u32 4294901760, %v243_v50  ;;  %v256_v23 = vand.u32 4294901760, %v255_v27  ;;  %v279_v26 = vsub.f32 %v4452_v59, %v5935_v51  ;;  %336 = vmatprep.mubr.f32.mxu0 %v5953_v1  ;;  %998 = vmatprep.mubr.f32.mxu1 %v5953_v1  ;;  %v250_v13 = vand.u32 4294901760, %v249_v56 }
  0x22   :  { %v3634_v36 = vpack.c.bf16 %v238_v55, %v226_v46  ;;  %v262_v40 = vand.u32 4294901760, %v261_v60  ;;  %v268_v41 = vand.u32 4294901760, %v267_v14  ;;  %v273_v50 = vsub.f32 %v4466_v63, %v272_v22 }
  0x23   :  { %v3636_v35 = vpack.c.bf16 %v256_v23, %v244_v16  ;;  %v280_v25 = vand.u32 4294901760, %v279_v26  ;;  %v284_v27 = vand.u32 4294901760, %v4468_v0  ;;  %v4557_v55 = vadd.s32 64, %v4261_v2 }
  0x24   :  { %3635 = vmatpush1.bf16.msra.mxu0 %v3634_v36  ;;  %3731 = vmatpush1.bf16.msra.mxu1 %v3634_v36  ;;  %v3638_v51 = vpack.c.bf16 %v262_v40, %v250_v13  ;;  %v274_v12 = vand.u32 4294901760, %v273_v50  ;;  %v4560_v26 = vadd.s32 72, %v4261_v2  ;;  %v3644_v60 = vpack.c.bf16 %v4331_v29, %v4329_v28 }
  0x25   :  { %3637 = vmatprep.subr.bf16.mxu0 %v3636_v35  ;;  %3733 = vmatprep.subr.bf16.mxu1 %v3636_v35  ;;  %v3640_v45 = vpack.c.bf16 %v280_v25, %v268_v41  ;;  %v285_v46 = vsub.f32 %v4468_v0, %v284_v27  ;;  %v3646_v14 = vpack.c.bf16 %v4348_v33, %v4340_v31  ;;  %v4581_v41 = vadd.s32 80, %v4261_v2 }
  0x26   :  { %v3648_v13 = vpack.c.bf16 %v4375_v39, %v4373_v38  ;;  %v4570_v25 = vpack.c.bf16 %v4388_v44, %v4386_v43  ;;  %v4574_v35 = vpack.c.bf16 %v4415_v49, %v4413_v48  ;;  %v4578_v40 = vpack.c.bf16 %v4428_v54, %v4426_v53 }
  0x27   :  { %v286_v56 = vand.u32 4294901760, %v285_v46  ;;  %v4589_v23 = vpack.c.bf16 %v4468_v0, %v4466_v63  ;;  %v4592_v36 = vadd.s32 88, %v4261_v2  ;;  %v4598_v50 = vpack.c.bf16 %v206_v4, %v194_v3 }
  0x28   :  { %3639 = vmatpush1.bf16.msra.mxu0 %v3638_v51  ;;  %3735 = vmatpush1.bf16.msra.mxu1 %v3638_v51  ;;  %v4585_v51 = vpack.c.bf16 %v4452_v59, %v4450_v58  ;;  %vm1439_vm13 = vcmp.eq.s32.totalorder %v4261_v2, %v4292_v15  ;;  %vm1441_vm14 = vcmp.eq.s32.totalorder %v4276_v7, %v4292_v15  ;;  %v6071_v28 = vand.u32 4294901760, %v4373_v38 }
  0x29   :  { %3641 = vmatprep.subr.bf16.mxu0 %v3640_v45  ;;  %3737 = vmatprep.subr.bf16.mxu1 %v3640_v45  ;;  %v3642_v16 = vpack.c.bf16 %v286_v56, %v274_v12  ;;  %vm1438_vm0 = vcmp.eq.s32.totalorder %v4261_v2, %v4296_v17  ;;  %v4610_v0 = vpack.c.bf16 %v212_v8, %v200_v6  ;;  %v6072_v29 = vand.u32 4294901760, %v4375_v39  ;;  %vm4624_vm1 = vmpackc.low %vm1441_vm14, %vm1439_vm13 }
  0x2a   :  { %v6073_v4 = vand.u32 4294901760, %v4388_v44  ;;  %v6074_v45 = vmov 0  ;;  %vm1440_vm3 = vcmp.eq.s32.totalorder %v4276_v7, %v4296_v17  ;;  %v6077_v31 = vand.u32 4294901760, %v4413_v48 }
  0x2b   :  { %v4616_v3 = vpack.c.bf16 %v6072_v29, %v6071_v28  ;;  %v6075_v45 = vsel %vm4624_vm1, 4294967295, %v6074_v45  ;;  %v6078_v33 = vand.u32 4294901760, %v4415_v49  ;;  %v3386_v39 = vsel %vm1439_vm13, 1.0, %v5953_v1  ;;  %vm4638_vm4 = vmpackc.low %vm1440_vm3, %vm1438_vm0 }
  0x2c   :  { %v4622_v12 = vpack.c.bf16 %v6073_v4, %v224_v61  ;;  %6076 = vst [vmem:[#allocation7_spill] sm:$0xff] %v6075_v45  ;;  %3643 = vmatpush1.bf16.msra.mxu0 %v3642_v16  ;;  %3739 = vmatpush1.bf16.msra.mxu1 %v3642_v16  ;;  %v3388_v43 = vsel %vm1441_vm14, 1.0, %v5953_v1  ;;  %v6079_v44 = vmov 0  ;;  %v4643_v6 = vadd.s32 96, %v4261_v2 }
  0x2d   :  { %v4634_v38 = vpack.c.bf16 %v6078_v33, %v6077_v31  ;;  %v6080_v44 = vsel %vm4638_vm4, 4294967295, %v6079_v44  ;;  %3645 = vmatprep.subr.bf16.mxu0 %v3644_v60  ;;  %3741 = vmatprep.subr.bf16.mxu1 %v3644_v60  ;;  %v3385_v7 = vsel %vm1438_vm0, 1.0, %v5953_v1  ;;  %v3387_v48 = vsel %vm1440_vm3, 1.0, %v5953_v1 }
  0x2e   :  { %6081 = vst [vmem:[#allocation8_spill] sm:$0xff] %v6080_v44  ;;  %vm1443_vm8 = vcmp.eq.s32.totalorder %v4281_v10, %v4292_v15  ;;  %vm5938_vm10 = vcmp.eq.s32.totalorder %v4284_v11, %v4292_v15  ;;  %v6082_v49 = vand.u32 4294901760, %v4426_v53  ;;  %v6083_v8 = vand.u32 4294901760, %v4428_v54 }
  0x2f   :  { %v6084_v46 = vand.u32 4294901760, %v4450_v58  ;;  %v6085_v56 = vand.u32 4294901760, %v4452_v59  ;;  %vm4666_vm13 = vmpackc.low %vm5938_vm10, %vm1443_vm8  ;;  %v6086_v16 = vmov 0  ;;  %vm5940_vm14 = vcmp.eq.s32.totalorder %v4281_v10, %v4296_v17  ;;  %338 = vmatmul.mubr.f32.vlgmr.msra.gmra.mrb[0].mxu0 %v4343_v32  ;;  %1000 = vmatmul.mubr.f32.vlgmr.msra.gmra.mrb[0].mxu1 %v4358_v34 }
  0x30   :  { %v4655_v61 = vpack.c.bf16 %v6083_v8, %v6082_v49  ;;  %v6087_v16 = vsel %vm4666_vm13, 4294967295, %v6086_v16  ;;  %vm5939_vm0 = vcmp.eq.s32.totalorder %v4284_v11, %v4296_v17  ;;  %v4678_v53 = vpack.c.bf16 %v284_v27, %v272_v22  ;;  %3647 = vmatpush1.bf16.msra.mxu0 %v3646_v14  ;;  %3743 = vmatpush1.bf16.msra.mxu1 %v3646_v14 }
  0x31   :  { %v4661_v60 = vpack.c.bf16 %v6085_v56, %v6084_v46  ;;  %6088 = vst [vmem:[#allocation9_spill] sm:$0xff] %v6087_v16  ;;  %v4680_v54 = vsub.f32 %v3386_v39, %v3386_v39  ;;  %v4682_v58 = vsub.f32 %v3388_v43, %v3388_v43  ;;  %v3390_v59 = vsel %vm1443_vm8, 1.0, %v5953_v1  ;;  %vm4691_vm3 = vmpackc.low %vm5939_vm0, %vm5940_vm14  ;;  %3649 = vmatprep.subr.bf16.mxu0 %v3648_v13 }
  0x32   :  { %v6089_v28 = vmov 0  ;;  %v4695_v63 = vsub.f32 %v3385_v7, %v3385_v7  ;;  %v4697_v22 = vsub.f32 %v3387_v48, %v3387_v48  ;;  %vm1447_vm10 = vcmp.eq.s32.totalorder %v4299_v18, %v4292_v15  ;;  %3745 = vmatprep.subr.bf16.mxu1 %v3648_v13  ;;  %440 = vmatprep.mubr.f32.mxu0 %v5953_v1 }
  0x33   :  { %v6090_v28 = vsel %vm4691_vm3, 4294967295, %v6089_v28  ;;  %v4702_v27 = vadd.s32 104, %v4261_v2  ;;  %vm1449_vm8 = vcmp.eq.s32.totalorder %v4302_v19, %v4292_v15  ;;  %vm1446_vm0 = vcmp.eq.s32.totalorder %v4299_v18, %v4296_v17  ;;  %1102 = vmatprep.mubr.f32.mxu1 %v5953_v1 }
  0x34   :  { %6091 = vst [vmem:[#allocation10_spill] sm:$0xff] %v6090_v28  ;;  %6092 = vst [vmem:[#allocation11_spill] sm:$0xff] %v4695_v63  ;;  %v4711_v14 = vadd.s32 112, %v4261_v2  ;;  %vm6093_vm3 = vcmp.eq.s32.totalorder %v4284_v11, %v4292_v15  ;;  %v4719_v29 = vsub.f32 %v3390_v59, %v3390_v59  ;;  %vm6094_vm13 = vcmp.eq.s32.totalorder %v4281_v10, %v4296_v17 }
  0x35   :  { %v3392_v13 = vsel %vm6093_vm3, 1.0, %v5953_v1  ;;  %v3389_v18 = vsel %vm6094_vm13, 1.0, %v5953_v1  ;;  %vm6095_vm14 = vcmp.eq.s32.totalorder %v4284_v11, %v4296_v17  ;;  %vm4729_vm4 = vmpackc.low %vm1449_vm8, %vm1447_vm10  ;;  %v6096_v31 = vmov 0  ;;  %3651 = vmatpush1.bf16.msra.mxu0 %v4570_v25  ;;  %3747 = vmatpush1.bf16.msra.mxu1 %v4570_v25 }
  0x36   :  { %v3391_v4 = vsel %vm6095_vm14, 1.0, %v5953_v1  ;;  %v6097_v31 = vsel %vm4729_vm4, 4294967295, %v6096_v31  ;;  %v3394_v33 = vsel %vm1447_vm10, 1.0, %v5953_v1  ;;  %v3396_v39 = vsel %vm1449_vm8, 1.0, %v5953_v1  ;;  %3653 = vmatprep.subr.bf16.mxu0 %v4574_v35  ;;  %3749 = vmatprep.subr.bf16.mxu1 %v4574_v35 }
  0x37   :  { %6098 = vst [vmem:[#allocation12_spill] sm:$0xff] %v6097_v31  ;;  %v3393_v43 = vsel %vm1446_vm0, 1.0, %v5953_v1  ;;  %vm6099_vm3 = vcmp.eq.s32.totalorder %v4302_v19, %v4296_v17  ;;  %v6100_v10 = vmov 0  ;;  %vm5946_vm13 = vcmp.eq.s32.totalorder %v4305_v20, %v4292_v15 }
  0x38   :  { %vm4739_vm1 = vmpackc.low %vm6099_vm3, %vm1446_vm0  ;;  %vm5945_vm14 = vcmp.eq.s32.totalorder %v4308_v21, %v4292_v15  ;;  %vm5950_vm0 = vcmp.eq.s32.totalorder %v4305_v20, %v4296_v17  ;;  %vm5949_vm8 = vcmp.eq.s32.totalorder %v4308_v21, %v4296_v17  ;;  %v4759_v7 = vsub.f32 %v3392_v13, %v3392_v13 }
  0x39   :  { %v6101_v10 = vsel %vm4739_vm1, 4294967295, %v6100_v10  ;;  %vm6103_vm10 = vmmov %vm6099_vm3  ;;  %v4761_v25 = vsub.f32 %v3389_v18, %v3389_v18  ;;  %v4763_v48 = vsub.f32 %v3391_v4, %v3391_v4  ;;  %v6104_v19 = vmov 0  ;;  %3655 = vmatpush1.bf16.msra.mxu0 %v4578_v40  ;;  %3751 = vmatpush1.bf16.msra.mxu1 %v4578_v40 }
  0x3a   :  { %6102 = vst [vmem:[#allocation13_spill] sm:$0xff] %v6101_v10  ;;  %v3395_v11 = vsel %vm6103_vm10, 1.0, %v5953_v1  ;;  %vm4771_vm3 = vmpackc.low %vm5945_vm14, %vm5946_vm13  ;;  %v4776_v49 = vadd.s32 120, %v4261_v2  ;;  %v4778_v35 = vsub.f32 %v3394_v33, %v3394_v33  ;;  %v4780_v8 = vsub.f32 %v3396_v39, %v3396_v39  ;;  %3657 = vmatprep.subr.bf16.mxu0 %v4585_v51  ;;  %3753 = vmatprep.subr.bf16.mxu1 %v4585_v51 }
  0x3b   :  { %v6105_v19 = vsel %vm4771_vm3, 4294967295, %v6104_v19  ;;  %v4782_v46 = vsub.f32 %v3393_v43, %v3393_v43  ;;  %vm4790_vm10 = vmpackc.low %vm5949_vm8, %vm5950_vm0  ;;  %v6107_v56 = vmov 0  ;;  %vm1455_vm14 = vcmp.eq.s32.totalorder %v4557_v55, %v4292_v15 }
  0x3c   :  { %6106 = vst [vmem:[#allocation14_spill] sm:$0xff] %v6105_v19  ;;  %v6108_v56 = vsel %vm4790_vm10, 4294967295, %v6107_v56  ;;  %v4796_v2 = vsub.f32 %v3395_v11, %v3395_v11  ;;  %vm1457_vm13 = vcmp.eq.s32.totalorder %v4560_v26, %v4292_v15  ;;  %vm1456_vm1 = vcmp.eq.s32.totalorder %v4560_v26, %v4296_v17 }
  0x3d   :  { %6109 = vst [vmem:[#allocation15_spill] sm:$0xff] %v6108_v56  ;;  %vm6110_vm8 = vcmp.eq.s32.totalorder %v4305_v20, %v4292_v15  ;;  %vm6111_vm0 = vcmp.eq.s32.totalorder %v4308_v21, %v4292_v15  ;;  %vm6112_vm3 = vcmp.eq.s32.totalorder %v4305_v20, %v4296_v17  ;;  %vm6113_vm10 = vcmp.eq.s32.totalorder %v4308_v21, %v4296_v17  ;;  %vm4822_vm4 = vmpackc.low %vm1457_vm13, %vm1455_vm14 }
  0x3e   :  { %v3398_v59 = vsel %vm6110_vm8, 1.0, %v5953_v1  ;;  %v3400_v13 = vsel %vm6111_vm0, 1.0, %v5953_v1  ;;  %v3397_v18 = vsel %vm6112_vm3, 1.0, %v5953_v1  ;;  %v3399_v26 = vsel %vm6113_vm10, 1.0, %v5953_v1  ;;  %3659 = vmatpush1.bf16.msra.mxu0 %v4589_v23  ;;  %3755 = vmatpush1.bf16.msra.mxu1 %v4589_v23 }
  0x3f   :  { %v6114_v40 = vmov 0  ;;  %v3402_v4 = vsel %vm1455_vm14, 1.0, %v5953_v1  ;;  %v3404_v33 = vsel %vm1457_vm13, 1.0, %v5953_v1  ;;  %vm6117_vm0 = vcmp.eq.s32.totalorder %v4557_v55, %v4296_v17 }
  0x40   :  { %v6115_v40 = vsel %vm4822_vm4, 4294967295, %v6114_v40  ;;  %v3401_v20 = vsel %vm6117_vm0, 1.0, %v5953_v1  ;;  %v3403_v21 = vsel %vm1456_vm1, 1.0, %v5953_v1  ;;  %vm6118_vm8 = vmmov %vm6117_vm0  ;;  %v6119_v39 = vmov 0 }
  0x41   :  { %6116 = vst [vmem:[#allocation16_spill] sm:$0xff] %v6115_v40  ;;  %vm4838_vm3 = vmpackc.low %vm1456_vm1, %vm6118_vm8  ;;  %vm1459_vm10 = vcmp.eq.s32.totalorder %v4581_v41, %v4292_v15  ;;  %vm5961_vm13 = vcmp.eq.s32.totalorder %v4592_v36, %v4292_v15  ;;  %vm1458_vm14 = vcmp.eq.s32.totalorder %v4581_v41, %v4296_v17  ;;  %vm5962_vm0 = vcmp.eq.s32.totalorder %v4592_v36, %v4296_v17 }
  0x42   :  { %v6120_v39 = vsel %vm4838_vm3, 4294967295, %v6119_v39  ;;  %v4850_v51 = vsub.f32 %v3398_v59, %v3398_v59  ;;  %v4852_v43 = vsub.f32 %v3400_v13, %v3400_v13  ;;  %v4854_v55 = vsub.f32 %v3397_v18, %v3397_v18  ;;  %vm4861_vm1 = vmpackc.low %vm5961_vm13, %vm1459_vm10  ;;  %443 = vmatmul.mubr.f32.vlgmr.msra.gmra.mrb[0].mxu0 %v4474_v5  ;;  %1105 = vmatmul.mubr.f32.vlgmr.msra.gmra.mrb[0].mxu1 %v4480_v9 }
  0x43   :  { %6121 = vst [vmem:[#allocation17_spill] sm:$0xff] %v6120_v39  ;;  %v4856_v11 = vsub.f32 %v3399_v26, %v3399_v26  ;;  %v6122_v1 = vmov 0  ;;  %v4867_v39 = vsub.f32 %v3402_v4, %v3402_v4  ;;  %v4869_v59 = vsub.f32 %v3404_v33, %v3404_v33  ;;  %vm4880_vm8 = vmpackc.low %vm5962_vm0, %vm1458_vm14 }
  0x44   :  { %v6123_v1 = vsel %vm4861_vm1, 4294967295, %v6122_v1  ;;  %v4871_v13 = vsub.f32 %v3401_v20, %v3401_v20  ;;  %v6125_v18 = vmov 0.0   ;;  %v6129_v40 = vmov 1.0|1.0  }
  0x45   :  { %6124 = vst [vmem:[#allocation18_spill] sm:$0xff] %v6123_v1  ;;  %v3406_v26 = vsel %vm1459_vm10, 1.0, %v6125_v18  ;;  %v6126_v1 = vmov 0  ;;  %3661 = vmatprep.subr.msk.bf16.mxu0 %vm4320_vm5, %v6129_v40  ;;  %3757 = vmatprep.subr.msk.bf16.mxu1 %vm4320_vm5, %v6129_v40  ;;  %v4890_v23 = vsub.f32 %v3403_v21, %v3403_v21  ;;  %vm1463_vm10 = vcmp.eq.s32.totalorder %v4643_v6, %v4292_v15 }
  0x46   :  { %v6127_v1 = vsel %vm4880_vm8, 4294967295, %v6126_v1  ;;  %vm1465_vm13 = vcmp.eq.s32.totalorder %v4702_v27, %v4292_v15  ;;  %vm6130_vm0 = vcmp.eq.s32.totalorder %v4592_v36, %v4292_v15  ;;  %v3405_v20 = vsel %vm1458_vm14, 1.0, %v6125_v18  ;;  %3663 = vmatpush1.bf16.msk.msra.mxu0 %vm4336_vm6, %v6129_v40  ;;  %3759 = vmatpush1.bf16.msk.msra.mxu1 %vm4336_vm6, %v6129_v40 }
  0x47   :  { %6128 = vst [vmem:[#allocation19_spill] sm:$0xff] %v6127_v1  ;;  %v3408_v33 = vsel %vm6130_vm0, 1.0, %v6125_v18  ;;  %vm4908_vm8 = vmpackc.low %vm1465_vm13, %vm1463_vm10  ;;  %v6131_v21 = vmov 0  ;;  %vm1462_vm1 = vcmp.eq.s32.totalorder %v4643_v6, %v4296_v17  ;;  %vm1464_vm3 = vcmp.eq.s32.totalorder %v4702_v27, %v4296_v17  ;;  %3665 = vmatprep.subr.msk.bf16.mxu0 %vm4362_vm9, %v6129_v40  ;;  %3761 = vmatprep.subr.msk.bf16.mxu1 %vm4362_vm9, %v6129_v40 }
  0x48   :  { %v6132_v21 = vsel %vm4908_vm8, 4294967295, %v6131_v21  ;;  %v4918_v4 = vsub.f32 %v3406_v26, %v3406_v26  ;;  %vm6134_vm14 = vcmp.eq.s32.totalorder %v4592_v36, %v4296_v17  ;;  %v3410_v1 = vsel %vm1463_vm10, 1.0, %v6125_v18  ;;  %vm4928_vm0 = vmpackc.low %vm1464_vm3, %vm1462_vm1  ;;  %529 = vmatprep.mubr.f32.mxu0 %v6125_v18  ;;  %1191 = vmatprep.mubr.f32.mxu1 %v6125_v18 }
  0x49   :  { %6133 = vst [vmem:[#allocation20_spill] sm:$0xff] %v6132_v21  ;;  %v3407_v41 = vsel %vm6134_vm14, 1.0, %v6125_v18  ;;  %v6135_v6 = vmov 0  ;;  %v3412_v36 = vsel %vm1465_vm13, 1.0, %v6125_v18  ;;  %v3409_v26 = vsel %vm1462_vm1, 1.0, %v6125_v18 }
  0x4a   :  { %v6136_v6 = vsel %vm4928_vm0, 4294967295, %v6135_v6  ;;  %vm1467_vm10 = vcmp.eq.s32.totalorder %v4711_v14, %v4292_v15  ;;  %vm1469_vm14 = vcmp.eq.s32.totalorder %v4776_v49, %v4292_v15  ;;  %vm1466_vm13 = vcmp.eq.s32.totalorder %v4711_v14, %v4296_v17  ;;  %3667 = vmatpush1.bf16.msk.msra.mxu0 %vm4382_vm12, %v6129_v40  ;;  %3763 = vmatpush1.bf16.msk.msra.mxu1 %vm4382_vm12, %v6129_v40 }
  0x4b   :  { %6137 = vst [vmem:[#allocation21_spill] sm:$0xff] %v6136_v6  ;;  %v4961_v21 = vsub.f32 %v3408_v33, %v3408_v33  ;;  %v4963_v6 = vsub.f32 %v3405_v20, %v3405_v20  ;;  %v4965_v56 = vsub.f32 %v3407_v41, %v3407_v41  ;;  %v3411_v19 = vsel %vm1464_vm3, 1.0, %v6125_v18  ;;  %vm4977_vm1 = vmpackc.low %vm1469_vm14, %vm1467_vm10  ;;  %3669 = vmatprep.subr.msk.bf16.mxu0 %vm4402_vm15, %v6129_v40 }
  0x4c   :  { %v6138_v10 = vmov 0  ;;  %v4981_v33 = vsub.f32 %v3410_v1, %v3410_v1  ;;  %v4983_v20 = vsub.f32 %v3412_v36, %v3412_v36  ;;  %v4985_v41 = vsub.f32 %v3409_v26, %v3409_v26  ;;  %3765 = vmatprep.subr.msk.bf16.mxu1 %vm4402_vm15, %v6129_v40 }
  0x4d   :  { %v6139_v10 = vsel %vm4977_vm1, 4294967295, %v6138_v10  ;;  %vm6141_vm3 = vcmp.eq.s32.totalorder %v4776_v49, %v4296_v17  ;;  %v6142_v27 = vmov 0  ;;  %v6145_v31 = vand.u32 4294901760, %v4680_v54 }
  0x4e   :  { %6140 = vst [vmem:[#allocation22_spill] sm:$0xff] %v6139_v10  ;;  %vm4993_vm0 = vmpackc.low %vm6141_vm3, %vm1466_vm13  ;;  %v3414_v1 = vsel %vm1467_vm10, 1.0, %v6125_v18  ;;  %v6146_v36 = vand.u32 4294901760, %v4682_v58  ;;  %v5023_v16 = vsub.f32 %v3411_v19, %v3411_v19  ;;  %v6004_v45 = vand.u32 4294901760, %v4719_v29  ;;  %3671 = vmatpush1.bf16.msk.msra.mxu0 %vm4422_vm2, %v6129_v40  ;;  %3767 = vmatpush1.bf16.msk.msra.mxu1 %vm4422_vm2, %v6129_v40 }
  0x4f   :  { %v6143_v27 = vsel %vm4993_vm0, 4294967295, %v6142_v27  ;;  %v1646_v10 = vsub.f32 %v4680_v54, %v6145_v31  ;;  %v6148_v37 = vand.u32 4294901760, %v4697_v22  ;;  %v5034_v47 = vsub.f32 %v3414_v1, %v3414_v1  ;;  %3673 = vmatprep.subr.msk.bf16.mxu0 %vm4436_vm7, %v6129_v40  ;;  %3769 = vmatprep.subr.msk.bf16.mxu1 %vm4436_vm7, %v6129_v40  ;;  %vm6150_vm10 = vmmov %vm6141_vm3 }
  0x50   :  { %6144 = vst [vmem:[#allocation23_spill] sm:$0xff] %v6143_v27  ;;  %v1658_v26 = vsub.f32 %v4682_v58, %v6146_v36  ;;  %v6147_v27 = vand.u32 4294901760, %v4695_v63  ;;  %v6003_v36 = vand.u32 4294901760, %v4759_v7  ;;  %v6011_v30 = vand.u32 4294901760, %v4761_v25 }
  0x51   :  { %v1647_v44 = vand.u32 4294901760, %v1646_v10  ;;  %v1670_v10 = vsub.f32 %v4719_v29, %v6004_v45  ;;  %v3413_v15 = vsel %vm1466_vm13, 1.0, %v6125_v18  ;;  %v6170_v52 = vand.u32 4294901760, %v4682_v58 }
  0x52   :  { %v1652_v31 = vsub.f32 %v4695_v63, %v6147_v27  ;;  %v3416_v27 = vsel %vm1469_vm14, 1.0, %v6125_v18  ;;  %v1659_v28 = vand.u32 4294901760, %v1658_v26  ;;  %v1664_v63 = vsub.f32 %v4697_v22, %v6148_v37  ;;  %3675 = vmatpush1.bf16.msk.msra.mxu0 %vm4462_vm11, %v6129_v40  ;;  %3771 = vmatpush1.bf16.msk.msra.mxu1 %vm4462_vm11, %v6129_v40 }
  0x53   :  { %v1682_v19 = vsub.f32 %v4759_v7, %v6003_v36  ;;  %v6009_v26 = vand.u32 4294901760, %v4763_v48  ;;  %v1671_v14 = vand.u32 4294901760, %v1670_v10  ;;  %v5077_v57 = vsub.f32 %v3413_v15, %v3413_v15  ;;  %3677 = vmatprep.subr.bf16.mxu0 %v4598_v50  ;;  %3773 = vmatprep.subr.bf16.mxu1 %v4598_v50 }
  0x54   :  { %v1653_v42 = vand.u32 4294901760, %v1652_v31  ;;  %v5053_v37 = vpack.c.bf16 %v1659_v28, %v1647_v44  ;;  %v1665_v1 = vand.u32 4294901760, %v1664_v63  ;;  %v3415_v31 = vsel %vm6150_vm10, 1.0, %v6125_v18 }
  0x55   :  { %v1683_v36 = vand.u32 4294901760, %v1682_v19  ;;  %v1676_v44 = vsub.f32 %v4761_v25, %v6011_v30  ;;  %v5069_v28 = vsub.f32 %v3416_v27, %v3416_v27  ;;  %v1688_v45 = vsub.f32 %v4763_v48, %v6009_v26 }
  0x56   :  { %6149 = vst [vmem:[#allocation24_spill] sm:$0xff] %v5053_v37  ;;  %v5071_v63 = vpack.c.bf16 %v1665_v1, %v1653_v42  ;;  %v6008_v37 = vand.u32 4294901760, %v4778_v35  ;;  %v6010_v10 = vand.u32 4294901760, %v4780_v8  ;;  %v6019_v19 = vand.u32 4294901760, %v4782_v46 }
  0x57   :  { %v5079_v17 = vpack.c.bf16 %v1683_v36, %v1671_v14  ;;  %v1677_v49 = vand.u32 4294901760, %v1676_v44  ;;  %v1689_v42 = vand.u32 4294901760, %v1688_v45  ;;  %v6014_v36 = vand.u32 4294901760, %v4796_v2 }
  0x58   :  { %v1694_v27 = vsub.f32 %v4778_v35, %v6008_v37  ;;  %v5095_v15 = vsub.f32 %v3415_v31, %v3415_v31  ;;  %v1706_v1 = vsub.f32 %v4780_v8, %v6010_v10  ;;  %v6012_v45 = vand.u32 4294901760, %v4850_v51 }
  0x59   :  { %v6013_v14 = vand.u32 4294901760, %v4852_v43  ;;  %v5102_v44 = vpack.c.bf16 %v1689_v42, %v1677_v49  ;;  %v1700_v26 = vsub.f32 %v4782_v46, %v6019_v19  ;;  %v1712_v50 = vsub.f32 %v4796_v2, %v6014_v36 }
  0x5a   :  { %v1695_v37 = vand.u32 4294901760, %v1694_v27  ;;  %v6151_v31 = vand.u32 4294901760, %v4474_v5  ;;  %v6152_v10 = vand.u32 4294901760, %v4480_v9  ;;  %v1707_v30 = vand.u32 4294901760, %v1706_v1 }
  0x5b   :  { %v1718_v49 = vsub.f32 %v4850_v51, %v6012_v45  ;;  %v1730_v42 = vsub.f32 %v4852_v43, %v6013_v14  ;;  %v6018_v27 = vand.u32 4294901760, %v4854_v55  ;;  %v1701_v5 = vand.u32 4294901760, %v1700_v26 }
  0x5c   :  { %533 = vmatmul.mubr.f32.vlgmr.msra.gmra.mrb[0].mxu0 %v6151_v31  ;;  %1195 = vmatmul.mubr.f32.vlgmr.msra.gmra.mrb[0].mxu1 %v6152_v10  ;;  %v1713_v31 = vand.u32 4294901760, %v1712_v50  ;;  %v6015_v9 = vand.u32 4294901760, %v4856_v11  ;;  %v6016_v10 = vand.u32 4294901760, %v4867_v39  ;;  %v5127_v1 = vpack.c.bf16 %v1707_v30, %v1695_v37 }
  0x5d   :  { %3679 = vmatpush1.bf16.msra.mxu0 %v4610_v0  ;;  %3775 = vmatpush1.bf16.msra.mxu1 %v4610_v0  ;;  %v1719_v45 = vand.u32 4294901760, %v1718_v49  ;;  %v1731_v14 = vand.u32 4294901760, %v1730_v42  ;;  %v1724_v36 = vsub.f32 %v4854_v55, %v6018_v27  ;;  %v6020_v49 = vand.u32 4294901760, %v4871_v13 }
  0x5e   :  { %3681 = vmatprep.subr.bf16.mxu0 %v4616_v3  ;;  %3777 = vmatprep.subr.bf16.mxu1 %v4616_v3  ;;  %v5134_v0 = vpack.c.bf16 %v1713_v31, %v1701_v5  ;;  %v1736_v26 = vsub.f32 %v4856_v11, %v6015_v9  ;;  %v1742_v30 = vsub.f32 %v4867_v39, %v6016_v10  ;;  %v6017_v3 = vand.u32 4294901760, %v4869_v59 }
  0x5f   :  { %651 = vmatprep.mubr.f32.mxu0 %v6125_v18  ;;  %1313 = vmatprep.mubr.f32.mxu1 %v6125_v18  ;;  %v5143_v37 = vpack.c.bf16 %v1731_v14, %v1719_v45  ;;  %v1725_v50 = vand.u32 4294901760, %v1724_v36  ;;  %v6021_v42 = vand.u32 4294901760, %v4890_v23  ;;  %v6024_v10 = vand.u32 4294901760, %v4918_v4 }
  0x60   :  { %v1737_v5 = vand.u32 4294901760, %v1736_v26  ;;  %v1743_v31 = vand.u32 4294901760, %v1742_v30  ;;  %v1754_v9 = vsub.f32 %v4869_v59, %v6017_v3  ;;  %v1748_v36 = vsub.f32 %v4871_v13, %v6020_v49 }
  0x61   :  { %3683 = vmatpush1.bf16.msra.mxu0 %v4622_v12  ;;  %3779 = vmatpush1.bf16.msra.mxu1 %v4622_v12  ;;  %v1760_v12 = vsub.f32 %v4890_v23, %v6021_v42  ;;  %v6023_v45 = vand.u32 4294901760, %v4961_v21  ;;  %v6022_v14 = vand.u32 4294901760, %v4963_v6  ;;  %v1766_v3 = vsub.f32 %v4918_v4, %v6024_v10 }
  0x62   :  { %3685 = vmatprep.subr.bf16.mxu0 %v4634_v38  ;;  %3781 = vmatprep.subr.bf16.mxu1 %v4634_v38  ;;  %v5163_v26 = vpack.c.bf16 %v1737_v5, %v1725_v50  ;;  %v1755_v30 = vand.u32 4294901760, %v1754_v9  ;;  %v6025_v38 = vand.u32 4294901760, %v4965_v56  ;;  %v1749_v27 = vand.u32 4294901760, %v1748_v36 }
  0x63   :  { %v1761_v19 = vand.u32 4294901760, %v1760_v12  ;;  %v1778_v49 = vsub.f32 %v4961_v21, %v6023_v45  ;;  %v1772_v42 = vsub.f32 %v4963_v6, %v6022_v14  ;;  %v1767_v50 = vand.u32 4294901760, %v1766_v3 }
  0x64   :  { %v5177_v9 = vpack.c.bf16 %v1755_v30, %v1743_v31  ;;  %v1784_v5 = vsub.f32 %v4965_v56, %v6025_v38  ;;  %v6033_v36 = vand.u32 4294901760, %v4981_v33  ;;  %v6028_v10 = vand.u32 4294901760, %v4983_v20 }
  0x65   :  { %3687 = vmatpush1.bf16.msra.mxu0 %v4655_v61  ;;  %3783 = vmatpush1.bf16.msra.mxu1 %v4655_v61  ;;  %v5185_v12 = vpack.c.bf16 %v1761_v19, %v1749_v27  ;;  %v1779_v14 = vand.u32 4294901760, %v1778_v49  ;;  %v1773_v45 = vand.u32 4294901760, %v1772_v42  ;;  %v6027_v31 = vand.u32 4294901760, %v4985_v41 }
  0x66   :  { %3689 = vmatprep.subr.bf16.mxu0 %v4661_v60  ;;  %3785 = vmatprep.subr.bf16.mxu1 %v4661_v60  ;;  %v1785_v61 = vand.u32 4294901760, %v1784_v5  ;;  %v1790_v3 = vsub.f32 %v4981_v33, %v6033_v36  ;;  %v6026_v30 = vand.u32 4294901760, %v5023_v16  ;;  %v1802_v60 = vsub.f32 %v4983_v20, %v6028_v10 }
  0x67   :  { %v5193_v38 = vpack.c.bf16 %v1779_v14, %v1767_v50  ;;  %v6029_v19 = vand.u32 4294901760, %v5034_v47  ;;  %v6030_v27 = vand.u32 4294901760, %v5069_v28  ;;  %v1796_v14 = vsub.f32 %v4985_v41, %v6027_v31 }
  0x68   :  { %v5202_v49 = vpack.c.bf16 %v1785_v61, %v1773_v45  ;;  %v1791_v42 = vand.u32 4294901760, %v1790_v3  ;;  %v1808_v50 = vsub.f32 %v5023_v16, %v6026_v30  ;;  %v6032_v61 = vand.u32 4294901760, %v5077_v57 }
  0x69   :  { %3691 = vmatpush1.bf16.msra.mxu0 %v4678_v53  ;;  %3787 = vmatpush1.bf16.msra.mxu1 %v4678_v53  ;;  %v1803_v53 = vand.u32 4294901760, %v1802_v60  ;;  %v1814_v45 = vsub.f32 %v5034_v47, %v6029_v19  ;;  %v1826_v5 = vsub.f32 %v5069_v28, %v6030_v27  ;;  %v1797_v3 = vand.u32 4294901760, %v1796_v14 }
  0x6a   :  { %3693 = vmatprep.subr.msk.bf16.mxu0 %vm4320_vm5, %v6129_v40  ;;  %3789 = vmatprep.subr.msk.bf16.mxu1 %vm4320_vm5, %v6129_v40  ;;  %v1809_v30 = vand.u32 4294901760, %v1808_v50  ;;  %v6031_v31 = vand.u32 4294901760, %v5095_v15  ;;  %v5226_v10 = vpack.c.bf16 %v4682_v58, %v4680_v54  ;;  %v1820_v27 = vsub.f32 %v5077_v57, %v6032_v61 }
  0x6b   :  { %v5230_v24 = vpack.c.bf16 %v1803_v53, %v1791_v42  ;;  %v1815_v60 = vand.u32 4294901760, %v1814_v45  ;;  %v1827_v19 = vand.u32 4294901760, %v1826_v5  ;;  %v6154_v53 = vld [vmem:[#allocation11_spill] sm:$0xff]  ;;  %v5270_v5 = vpack.c.bf16 %v4780_v8, %v4778_v35 }
  0x6c   :  { %653 = vmatmul.mubr.f32.vlgmr.msra.gmra.mrb[0].mxu0 %v4343_v32  ;;  %1315 = vmatmul.mubr.f32.vlgmr.msra.gmra.mrb[0].mxu1 %v4358_v34  ;;  %v5241_v50 = vpack.c.bf16 %v1809_v30, %v1797_v3  ;;  %v1832_v42 = vsub.f32 %v5095_v15, %v6031_v31  ;;  %v5248_v45 = vpack.c.bf16 %v4697_v22, %v6154_v53  ;;  %v1821_v30 = vand.u32 4294901760, %v1820_v27 }
  0x6d   :  { %3695 = vmatpush1.bf16.msk.msra.mxu0 %vm4336_vm6, %v6129_v40  ;;  %3791 = vmatpush1.bf16.msk.msra.mxu1 %vm4336_vm6, %v6129_v40  ;;  %v5256_v14 = vpack.c.bf16 %v1827_v19, %v1815_v60  ;;  %v5260_v3 = vpack.c.bf16 %v4759_v7, %v4719_v29  ;;  %v5264_v31 = vpack.c.bf16 %v4763_v48, %v4761_v25  ;;  %v6177_v58 = vand.u32 4294901760, %v4719_v29  ;;  %v6183_v29 = vld [vmem:[#allocation10_spill] sm:$0xff] }
  0x6e   :  { %3697 = vmatprep.subr.msk.bf16.mxu0 %vm4362_vm9, %v6129_v40  ;;  %3793 = vmatprep.subr.msk.bf16.mxu1 %vm4362_vm9, %v6129_v40  ;;  %v1833_v61 = vand.u32 4294901760, %v1832_v42  ;;  %6156 = vst [vmem:[#allocation2_spill] sm:$0xff] %v5270_v5  ;;  %v5274_v19 = vpack.c.bf16 %v4796_v2, %v4782_v46  ;;  %v5278_v27 = vpack.c.bf16 %v4852_v43, %v4850_v51 }
  0x6f   :  { %739 = vmatprep.mubr.f32.mxu0 %v6125_v18  ;;  %1401 = vmatprep.mubr.f32.mxu1 %v6125_v18  ;;  %v5282_v60 = vpack.c.bf16 %v4856_v11, %v4854_v55  ;;  %v5286_v36 = vpack.c.bf16 %v4869_v59, %v4867_v39  ;;  %v5290_v42 = vpack.c.bf16 %v4890_v23, %v4871_v13 }
  0x70   :  { %6157 = vst [vmem:[#allocation11_spill] sm:$0xff] %v5274_v19  ;;  %v5294_v5 = vpack.c.bf16 %v4961_v21, %v4918_v4  ;;  %v5328_v19 = vpack.c.bf16 %v5095_v15, %v5077_v57 }
  0x71   :  { %6158 = vst [vmem:[#allocation3_spill] sm:$0xff] %v5282_v60  ;;  %6159 = vst [vmem:[#allocation25_spill] sm:$0xff] %v5286_v36  ;;  %3699 = vmatpush1.bf16.msk.msra.mxu0 %vm4382_vm12, %v6129_v40  ;;  %3795 = vmatpush1.bf16.msk.msra.mxu1 %vm4382_vm12, %v6129_v40  ;;  %v5302_v60 = vpack.c.bf16 %v1833_v61, %v1821_v30  ;;  %v5306_v36 = vpack.c.bf16 %v4965_v56, %v4963_v6  ;;  %vm6184_vm12 = vnez %v6183_v29 }
  0x72   :  { %6160 = vst [vmem:[#allocation26_spill] sm:$0xff] %v5290_v42  ;;  %6161 = vst [vmem:[#allocation27_spill] sm:$0xff] %v5294_v5  ;;  %v5310_v42 = vpack.c.bf16 %v4983_v20, %v4981_v33  ;;  %3701 = vmatprep.subr.msk.bf16.mxu0 %vm4402_vm15, %v6129_v40  ;;  %3797 = vmatprep.subr.msk.bf16.mxu1 %vm4402_vm15, %v6129_v40  ;;  %v5320_v61 = vpack.c.bf16 %v5023_v16, %v4985_v41  ;;  %v6173_v5 = vand.u32 4294901760, %v6154_v53 }
  0x73   :  { %v5324_v30 = vpack.c.bf16 %v5069_v28, %v5034_v47  ;;  %6167 = vst [vmem:[#allocation29_spill] sm:$0xff] %v5328_v19  ;;  %v6169_v19 = vand.u32 4294901760, %v4680_v54  ;;  %v6175_v54 = vld [vmem:[#allocation8_spill] sm:$0xff]  ;;  %v6178_v53 = vand.u32 4294901760, %v4759_v7  ;;  %v6185_v7 = vand.u32 4294901760, %v4778_v35  ;;  %v6192_v35 = vld [vmem:[#allocation13_spill] sm:$0xff] }
  0x74   :  { %6163 = vst [vmem:[#allocation4_spill] sm:$0xff] %v5310_v42  ;;  %6165 = vst [vmem:[#allocation5_spill] sm:$0xff] %v5320_v61  ;;  %v6171_v61 = vld [vmem:[#allocation7_spill] sm:$0xff]  ;;  %v6174_v42 = vand.u32 4294901760, %v4697_v22  ;;  %vm6176_vm6 = vnez %v6175_v54  ;;  %v6179_v22 = vld [vmem:[#allocation9_spill] sm:$0xff] }
  0x75   :  { %6166 = vst [vmem:[#allocation28_spill] sm:$0xff] %v5324_v30  ;;  %3703 = vmatpush1.bf16.msk.msra.mxu0 %vm4422_vm2, %v6129_v40  ;;  %3799 = vmatpush1.bf16.msk.msra.mxu1 %vm4422_vm2, %v6129_v40  ;;  %v5352_v30 = vpack.c.bf16 %v6170_v52, %v6169_v19  ;;  %vm6172_vm5 = vnez %v6171_v61  ;;  %v5378_v19 = vpack.c.bf16 %v6178_v53, %v6177_v58  ;;  %v6190_v58 = vand.u32 4294901760, %v4796_v2 }
  0x76   :  { %3705 = vmatprep.subr.msk.bf16.mxu0 %vm4436_vm7, %v6129_v40  ;;  %3801 = vmatprep.subr.msk.bf16.mxu1 %vm4436_vm7, %v6129_v40  ;;  %v5364_v62 = vpack.c.bf16 %v6174_v42, %v6173_v5  ;;  %vm6180_vm9 = vnez %v6179_v22  ;;  %v6189_v5 = vand.u32 4294901760, %v4782_v46  ;;  %vm6193_vm2 = vnez %v6192_v35  ;;  %v3513_v46 = vld [vmem:[%s5922_s2 + $0x4] sm:$0x7] }
  0x77   :  { %v6194_v2 = vand.u32 4294901760, %v4850_v51  ;;  %v5450_v51 = vand.u32 4294901760, %v3513_v46 }
  0x78   :  { %v5416_v53 = vpack.c.bf16 %v6190_v58, %v6189_v5  ;;  %v6199_v5 = vand.u32 4294901760, %v4856_v11 }
  0x79   :  { %3707 = vmatpush1.bf16.msk.msra.mxu0 %vm4462_vm11, %v6129_v40  ;;  %3803 = vmatpush1.bf16.msk.msra.mxu1 %vm4462_vm11, %v6129_v40 }
  0x7a   :  { %3805 = vmatprep.subr.msk.bf16.mxu0 %vm6172_vm5, %v6129_v40  ;;  %3997 = vmatprep.subr.msk.bf16.mxu1 %vm6172_vm5, %v6129_v40  ;;  %6191 = vst [vmem:[#allocation6_spill] sm:$0xff] %v5416_v53 }
  0x7c   :  { %741 = vmatmul.mubr.f32.vlgmr.msra.gmra.mrb[0].mxu0 %v4343_v32  ;;  %1403 = vmatmul.mubr.f32.vlgmr.msra.gmra.mrb[0].mxu1 %v4358_v34  ;;  %v6181_v32 = vand.u32 4294901760, %v4761_v25  ;;  %v6182_v34 = vand.u32 4294901760, %v4763_v48  ;;  %v6186_v25 = vand.u32 4294901760, %v4780_v8  ;;  %v6187_v48 = vld [vmem:[#allocation12_spill] sm:$0xff]  ;;  %v1534_v8 = vld [vmem:[%s5922_s2] sm:$0x7] }
  0x7d   :  { %3807 = vmatpush1.bf16.msk.msra.mxu0 %vm6176_vm6, %v6129_v40  ;;  %3999 = vmatpush1.bf16.msk.msra.mxu1 %vm6176_vm6, %v6129_v40  ;;  %vm6188_vm15 = vnez %v6187_v48  ;;  %v5448_v53 = vand.u32 4294901760, %v1534_v8 }
  0x7e   :  { %3809 = vmatprep.subr.msk.bf16.mxu0 %vm6180_vm9, %v6129_v40  ;;  %4001 = vmatprep.subr.msk.bf16.mxu1 %vm6180_vm9, %v6129_v40  ;;  %v5390_v42 = vpack.c.bf16 %v6182_v34, %v6181_v32  ;;  %v5404_v52 = vpack.c.bf16 %v6186_v25, %v6185_v7  ;;  %v6195_v32 = vand.u32 4294901760, %v4852_v43  ;;  %v6196_v7 = vld [vmem:[#allocation14_spill] sm:$0xff]  ;;  %v6198_v25 = vand.u32 4294901760, %v4854_v55  ;;  %v6201_v43 = vld [vmem:[#allocation15_spill] sm:$0xff] }
  0x7f   :  { %1631 = vmatprep.mubr.f32.mxu0 %v6125_v18  ;;  %2496 = vmatprep.mubr.f32.mxu1 %v6125_v18  ;;  %vm6197_vm7 = vnez %v6196_v7  ;;  %vm6202_vm11 = vnez %v6201_v43  ;;  %v6204_v55 = vand.u32 4294901760, %v4869_v59  ;;  %v5480_v59 = vsub.f32 %v3513_v46, %v5450_v51 }
  0x80   :  { %v5434_v34 = vpack.c.bf16 %v6195_v32, %v6194_v2  ;;  %v5446_v58 = vpack.c.bf16 %v6199_v5, %v6198_v25  ;;  %v6203_v2 = vand.u32 4294901760, %v4867_v39  ;;  %v6206_v25 = vand.u32 4294901760, %v4871_v13 }
  0x81   :  { %3811 = vmatpush1.bf16.msk.msra.mxu0 %vm6184_vm12, %v6129_v40  ;;  %4003 = vmatpush1.bf16.msk.msra.mxu1 %vm6184_vm12, %v6129_v40  ;;  %v6207_v5 = vand.u32 4294901760, %v4890_v23  ;;  %v5477_v39 = vsub.f32 %v1534_v8, %v5448_v53  ;;  %v6210_v13 = vand.u32 4294901760, %v4918_v4  ;;  %v6211_v23 = vand.u32 4294901760, %v4961_v21  ;;  %v6213_v8 = vld [vmem:[#allocation18_spill] sm:$0xff] }
  0x82   :  { %3813 = vmatprep.subr.msk.bf16.mxu0 %vm6188_vm15, %v6129_v40  ;;  %4005 = vmatprep.subr.msk.bf16.mxu1 %vm6188_vm15, %v6129_v40  ;;  %6200 = vst [vmem:[#allocation7_spill] sm:$0xff] %v5446_v58  ;;  %v5462_v32 = vpack.c.bf16 %v6204_v55, %v6203_v2  ;;  %v6208_v2 = vld [vmem:[#allocation17_spill] sm:$0xff]  ;;  %vm6214_vm13 = vnez %v6213_v8  ;;  %v6215_v46 = vand.u32 4294901760, %v4963_v6  ;;  %v6220_v6 = vand.u32 4294901760, %v4983_v20 }
  0x83   :  { %v5474_v58 = vpack.c.bf16 %v6207_v5, %v6206_v25  ;;  %vm6209_vm14 = vnez %v6208_v2  ;;  %v5492_v55 = vpack.c.bf16 %v6211_v23, %v6210_v13  ;;  %v6216_v25 = vand.u32 4294901760, %v4965_v56  ;;  %v6217_v13 = vld [vmem:[#allocation19_spill] sm:$0xff] }
  0x84   :  { %v6047_v4 = vand.u32 4294901760, %v5477_v39  ;;  %vm6218_vm3 = vnez %v6217_v13  ;;  %v6219_v23 = vand.u32 4294901760, %v4981_v33  ;;  %v6226_v20 = vand.u32 4294901760, %v5480_v59 }
  0x85   :  { %3815 = vmatpush1.bf16.msk.msra.mxu0 %vm6193_vm2, %v6129_v40  ;;  %4007 = vmatpush1.bf16.msk.msra.mxu1 %vm6193_vm2, %v6129_v40  ;;  %6212 = vst [vmem:[#allocation8_spill] sm:$0xff] %v5492_v55  ;;  %v5504_v5 = vpack.c.bf16 %v6216_v25, %v6215_v46  ;;  %v6223_v46 = vand.u32 4294901760, %v4985_v41  ;;  %v6224_v25 = vand.u32 4294901760, %v5023_v16  ;;  %v6229_v16 = vand.u32 4294901760, %v5034_v47 }
  0x86   :  { %3817 = vmatprep.subr.msk.bf16.mxu0 %vm6197_vm7, %v6129_v40  ;;  %4009 = vmatprep.subr.msk.bf16.mxu1 %vm6197_vm7, %v6129_v40  ;;  %v5518_v55 = vpack.c.bf16 %v6220_v6, %v6219_v23  ;;  %v1635_v33 = vsub.f32 %v5477_v39, %v6047_v4  ;;  %v2500_v23 = vsub.f32 %v5480_v59, %v6226_v20  ;;  %v6227_v6 = vld [vmem:[#allocation21_spill] sm:$0xff]  ;;  %v6230_v41 = vand.u32 4294901760, %v5069_v28 }
  0x87   :  { %v5530_v21 = vpack.c.bf16 %v6224_v25, %v6223_v46  ;;  %vm6228_vm10 = vnez %v6227_v6  ;;  %v6232_v20 = vand.u32 4294901760, %v5077_v57  ;;  %v6233_v4 = vand.u32 4294901760, %v5095_v15  ;;  %v17_v57 = vld [vmem:[%s5923_s0] sm:$0xff] }
  0x88   :  { %6221 = vst [vmem:[#allocation9_spill] sm:$0xff] %v5518_v55  ;;  %v5548_v46 = vpack.c.bf16 %v6230_v41, %v6229_v16  ;;  %v1636_v55 = vand.u32 4294901760, %v1635_v33  ;;  %v2501_v47 = vand.u32 4294901760, %v2500_v23  ;;  %v6235_v16 = vld [vmem:[#allocation24_spill] sm:$0xff]  ;;  %25 = vst [vmem:[%s5924_s4] sm:$0xf] %v17_v57 }
  0x89   :  { %3819 = vmatpush1.bf16.msk.msra.mxu0 %vm6202_vm11, %v6129_v40  ;;  %4011 = vmatpush1.bf16.msk.msra.mxu1 %vm6202_vm11, %v6129_v40  ;;  %6225 = vst [vmem:[#allocation10_spill] sm:$0xff] %v5530_v21  ;;  %v5560_v21 = vpack.c.bf16 %v6233_v4, %v6232_v20 }
  0x8a   :  { %3821 = vmatprep.subr.msk.bf16.mxu0 %vm4822_vm4, %v6129_v40  ;;  %4013 = vmatprep.subr.msk.bf16.mxu1 %vm4822_vm4, %v6129_v40 }
  0x8d   :  { %3823 = vmatpush1.bf16.msk.msra.mxu0 %vm6209_vm14, %v6129_v40  ;;  %4015 = vmatpush1.bf16.msk.msra.mxu1 %vm6209_vm14, %v6129_v40 }
  0x8e   :  { %3825 = vmatprep.subr.msk.bf16.mxu0 %vm6214_vm13, %v6129_v40  ;;  %4017 = vmatprep.subr.msk.bf16.mxu1 %vm6214_vm13, %v6129_v40 }
  0x91   :  { %3827 = vmatpush1.bf16.msk.msra.mxu0 %vm6218_vm3, %v6129_v40  ;;  %4019 = vmatpush1.bf16.msk.msra.mxu1 %vm6218_vm3, %v6129_v40 }
  0x92   :  { %3829 = vmatprep.subr.msk.bf16.mxu0 %vm4908_vm8, %v6129_v40  ;;  %4021 = vmatprep.subr.msk.bf16.mxu1 %vm4908_vm8, %v6129_v40 }
  0x95   :  { %3831 = vmatpush1.bf16.msk.msra.mxu0 %vm6228_vm10, %v6129_v40  ;;  %4023 = vmatpush1.bf16.msk.msra.mxu1 %vm6228_vm10, %v6129_v40 }
  0x96   :  { %3833 = vmatprep.subr.msk.bf16.mxu0 %vm4977_vm1, %v6129_v40  ;;  %4025 = vmatprep.subr.msk.bf16.mxu1 %vm4977_vm1, %v6129_v40 }
  0x99   :  { %3835 = vmatpush1.bf16.msk.msra.mxu0 %vm4993_vm0, %v6129_v40  ;;  %4027 = vmatpush1.bf16.msk.msra.mxu1 %vm4993_vm0, %v6129_v40 }
  0x9a   :  { %3837 = vmatprep.subr.bf16.mxu0 %v6235_v16  ;;  %4029 = vmatprep.subr.bf16.mxu1 %v6235_v16 }
  0x9c   :  { %1637 = vmatmul.mubr.f32.vlgmr.msra.gmra.mrb[2].mxu0 %v1636_v55  ;;  %2502 = vmatmul.mubr.f32.vlgmr.msra.gmra.mrb[2].mxu1 %v2501_v47 }
  0x9d   :  { %3839 = vmatpush1.bf16.msra.mxu0 %v5071_v63  ;;  %4031 = vmatpush1.bf16.msra.mxu1 %v5071_v63  ;;  %v18_v63 = vld [vmem:[%s5923_s0 + $0x8] sm:$0xff] }
  0x9e   :  { %3841 = vmatprep.subr.bf16.mxu0 %v5079_v17  ;;  %4033 = vmatprep.subr.bf16.mxu1 %v5079_v17  ;;  %v21_v17 = vcombine.high %v17_v57, %v17_v57  ;;  %v22_v15 = vcombine.high %v18_v63, %v18_v63  ;;  %27 = vst [vmem:[%s5924_s4 + $0x20] sm:$0xf] %v18_v63 }
  0x9f   :  { %1867 = vmatprep.mubr.f32.mxu0 %v6125_v18  ;;  %2732 = vmatprep.mubr.f32.mxu1 %v6125_v18 }
  0xa0   :  { %26 = vst [vmem:[%s5924_s4 + $0x8] sm:$0xf] %v21_v17  ;;  %28 = vst [vmem:[%s5924_s4 + $0x28] sm:$0xf] %v22_v15 }
  0xa1   :  { %3843 = vmatpush1.bf16.msra.mxu0 %v5102_v44  ;;  %4035 = vmatpush1.bf16.msra.mxu1 %v5102_v44  ;;  %v6236_v44 = vld [vmem:[#allocation2_spill] sm:$0xff] }
  0xa2   :  { %3845 = vmatprep.subr.bf16.mxu0 %v5127_v1  ;;  %4037 = vmatprep.subr.bf16.mxu1 %v5127_v1  ;;  %v6238_v1 = vld [vmem:[#allocation3_spill] sm:$0xff] }
  0xa5   :  { %3847 = vmatpush1.bf16.msra.mxu0 %v5134_v0  ;;  %4039 = vmatpush1.bf16.msra.mxu1 %v5134_v0  ;;  %v6239_v0 = vld [vmem:[#allocation25_spill] sm:$0xff] }
  0xa6   :  { %3849 = vmatprep.subr.bf16.mxu0 %v5143_v37  ;;  %4041 = vmatprep.subr.bf16.mxu1 %v5143_v37  ;;  %v6240_v37 = vld [vmem:[#allocation26_spill] sm:$0xff] }
  0xa9   :  { %3851 = vmatpush1.bf16.msra.mxu0 %v5163_v26  ;;  %4043 = vmatpush1.bf16.msra.mxu1 %v5163_v26  ;;  %v6241_v26 = vld [vmem:[#allocation27_spill] sm:$0xff] }
  0xaa   :  { %3853 = vmatprep.subr.bf16.mxu0 %v5177_v9  ;;  %4045 = vmatprep.subr.bf16.mxu1 %v5177_v9  ;;  %v6243_v9 = vld [vmem:[#allocation5_spill] sm:$0xff] }
  0xad   :  { %3855 = vmatpush1.bf16.msra.mxu0 %v5185_v12  ;;  %4047 = vmatpush1.bf16.msra.mxu1 %v5185_v12  ;;  %v6244_v12 = vld [vmem:[#allocation28_spill] sm:$0xff] }
  0xae   :  { %3857 = vmatprep.subr.bf16.mxu0 %v5193_v38  ;;  %4049 = vmatprep.subr.bf16.mxu1 %v5193_v38  ;;  %v6242_v38 = vld [vmem:[#allocation4_spill] sm:$0xff] }
  0xb1   :  { %3859 = vmatpush1.bf16.msra.mxu0 %v5202_v49  ;;  %4051 = vmatpush1.bf16.msra.mxu1 %v5202_v49  ;;  %v6247_v49 = vand.u32 4294901760, %v5480_v59 }
  0xb2   :  { %3861 = vmatprep.subr.bf16.mxu0 %v5230_v24  ;;  %4053 = vmatprep.subr.bf16.mxu1 %v5230_v24  ;;  %v6248_v24 = vld [vmem:[#allocation6_spill] sm:$0xff] }
  0xb5   :  { %3863 = vmatpush1.bf16.msra.mxu0 %v5241_v50  ;;  %4055 = vmatpush1.bf16.msra.mxu1 %v5241_v50  ;;  %v6249_v50 = vld [vmem:[#allocation7_spill] sm:$0xff] }
  0xb6   :  { %3865 = vmatprep.subr.bf16.mxu0 %v5256_v14  ;;  %4057 = vmatprep.subr.bf16.mxu1 %v5256_v14  ;;  %v6251_v14 = vld [vmem:[#allocation9_spill] sm:$0xff] }
  0xb9   :  { %3867 = vmatpush1.bf16.msra.mxu0 %v5302_v60  ;;  %4059 = vmatpush1.bf16.msra.mxu1 %v5302_v60 }
  0xba   :  { %3869 = vmatprep.subr.bf16.mxu0 %v5226_v10  ;;  %4061 = vmatprep.subr.bf16.mxu1 %v5226_v10  ;;  %v6237_v10 = vld [vmem:[#allocation11_spill] sm:$0xff] }
  0xbc   :  { %1869 = vmatmul.mubr.f32.vlgmr.msra.gmra.mrb[2].mxu0 %v5448_v53  ;;  %2734 = vmatmul.mubr.f32.vlgmr.msra.gmra.mrb[2].mxu1 %v5450_v51 }
  0xbd   :  { %3871 = vmatpush1.bf16.msra.mxu0 %v5248_v45  ;;  %4063 = vmatpush1.bf16.msra.mxu1 %v5248_v45  ;;  %v6250_v45 = vld [vmem:[#allocation8_spill] sm:$0xff] }
  0xbe   :  { %3873 = vmatprep.subr.bf16.mxu0 %v5260_v3  ;;  %4065 = vmatprep.subr.bf16.mxu1 %v5260_v3  ;;  %v6252_v3 = vld [vmem:[#allocation10_spill] sm:$0xff] }
  0xbf   :  { %2003 = vmatprep.mubr.f32.mxu0 %v6125_v18  ;;  %2868 = vmatprep.mubr.f32.mxu1 %v6125_v18 }
  0xc1   :  { %3875 = vmatpush1.bf16.msra.mxu0 %v5264_v31  ;;  %4067 = vmatpush1.bf16.msra.mxu1 %v5264_v31  ;;  %v6245_v31 = vld [vmem:[#allocation29_spill] sm:$0xff] }
  0xc2   :  { %3877 = vmatprep.subr.bf16.mxu0 %v6236_v44  ;;  %4069 = vmatprep.subr.bf16.mxu1 %v6236_v44 }
  0xc5   :  { %3879 = vmatpush1.bf16.msra.mxu0 %v6237_v10  ;;  %4071 = vmatpush1.bf16.msra.mxu1 %v6237_v10 }
  0xc6   :  { %3881 = vmatprep.subr.bf16.mxu0 %v5278_v27  ;;  %4073 = vmatprep.subr.bf16.mxu1 %v5278_v27 }
  0xc9   :  { %3883 = vmatpush1.bf16.msra.mxu0 %v6238_v1  ;;  %4075 = vmatpush1.bf16.msra.mxu1 %v6238_v1 }
  0xca   :  { %3885 = vmatprep.subr.bf16.mxu0 %v6239_v0  ;;  %4077 = vmatprep.subr.bf16.mxu1 %v6239_v0 }
  0xcd   :  { %3887 = vmatpush1.bf16.msra.mxu0 %v6240_v37  ;;  %4079 = vmatpush1.bf16.msra.mxu1 %v6240_v37 }
  0xce   :  { %3889 = vmatprep.subr.bf16.mxu0 %v6241_v26  ;;  %4081 = vmatprep.subr.bf16.mxu1 %v6241_v26 }
  0xd1   :  { %3891 = vmatpush1.bf16.msra.mxu0 %v5306_v36  ;;  %4083 = vmatpush1.bf16.msra.mxu1 %v5306_v36  ;;  %v6246_v36 = vand.u32 4294901760, %v5477_v39 }
  0xd2   :  { %3893 = vmatprep.subr.bf16.mxu0 %v6242_v38  ;;  %4085 = vmatprep.subr.bf16.mxu1 %v6242_v38 }
  0xd5   :  { %3895 = vmatpush1.bf16.msra.mxu0 %v6243_v9  ;;  %4087 = vmatpush1.bf16.msra.mxu1 %v6243_v9 }
  0xd6   :  { %3897 = vmatprep.subr.bf16.mxu0 %v6244_v12  ;;  %4089 = vmatprep.subr.bf16.mxu1 %v6244_v12 }
  0xd9   :  { %3899 = vmatpush1.bf16.msra.mxu0 %v6245_v31  ;;  %4091 = vmatpush1.bf16.msra.mxu1 %v6245_v31 }
  0xda   :  { %3901 = vmatprep.subr.msk.bf16.mxu0 %vm6172_vm5, %v6129_v40  ;;  %4093 = vmatprep.subr.msk.bf16.mxu1 %vm6172_vm5, %v6129_v40 }
  0xdc   :  { %2006 = vmatmul.mubr.f32.vlgmr.msra.gmra.mrb[2].mxu0 %v5477_v39  ;;  %2871 = vmatmul.mubr.f32.vlgmr.msra.gmra.mrb[2].mxu1 %v5480_v59 }
  0xdd   :  { %3903 = vmatpush1.bf16.msk.msra.mxu0 %vm6176_vm6, %v6129_v40  ;;  %4095 = vmatpush1.bf16.msk.msra.mxu1 %vm6176_vm6, %v6129_v40 }
  0xde   :  { %3905 = vmatprep.subr.msk.bf16.mxu0 %vm6180_vm9, %v6129_v40  ;;  %4097 = vmatprep.subr.msk.bf16.mxu1 %vm6180_vm9, %v6129_v40 }
  0xdf   :  { %2108 = vmatprep.mubr.f32.mxu0 %v6125_v18  ;;  %2973 = vmatprep.mubr.f32.mxu1 %v6125_v18 }
  0xe1   :  { %3907 = vmatpush1.bf16.msk.msra.mxu0 %vm6184_vm12, %v6129_v40  ;;  %4099 = vmatpush1.bf16.msk.msra.mxu1 %vm6184_vm12, %v6129_v40 }
  0xe2   :  { %3909 = vmatprep.subr.msk.bf16.mxu0 %vm6188_vm15, %v6129_v40  ;;  %4101 = vmatprep.subr.msk.bf16.mxu1 %vm6188_vm15, %v6129_v40 }
  0xe5   :  { %3911 = vmatpush1.bf16.msk.msra.mxu0 %vm6193_vm2, %v6129_v40  ;;  %4103 = vmatpush1.bf16.msk.msra.mxu1 %vm6193_vm2, %v6129_v40 }
  0xe6   :  { %3913 = vmatprep.subr.msk.bf16.mxu0 %vm6197_vm7, %v6129_v40  ;;  %4105 = vmatprep.subr.msk.bf16.mxu1 %vm6197_vm7, %v6129_v40 }
  0xe9   :  { %3915 = vmatpush1.bf16.msk.msra.mxu0 %vm6202_vm11, %v6129_v40  ;;  %4107 = vmatpush1.bf16.msk.msra.mxu1 %vm6202_vm11, %v6129_v40 }
  0xea   :  { %3917 = vmatprep.subr.msk.bf16.mxu0 %vm4822_vm4, %v6129_v40  ;;  %4109 = vmatprep.subr.msk.bf16.mxu1 %vm4822_vm4, %v6129_v40 }
  0xed   :  { %3919 = vmatpush1.bf16.msk.msra.mxu0 %vm6209_vm14, %v6129_v40  ;;  %4111 = vmatpush1.bf16.msk.msra.mxu1 %vm6209_vm14, %v6129_v40 }
  0xee   :  { %3921 = vmatprep.subr.msk.bf16.mxu0 %vm6214_vm13, %v6129_v40  ;;  %4113 = vmatprep.subr.msk.bf16.mxu1 %vm6214_vm13, %v6129_v40 }
  0xf1   :  { %3923 = vmatpush1.bf16.msk.msra.mxu0 %vm6218_vm3, %v6129_v40  ;;  %4115 = vmatpush1.bf16.msk.msra.mxu1 %vm6218_vm3, %v6129_v40 }
  0xf2   :  { %3925 = vmatprep.subr.msk.bf16.mxu0 %vm4908_vm8, %v6129_v40  ;;  %4117 = vmatprep.subr.msk.bf16.mxu1 %vm4908_vm8, %v6129_v40 }
  0xf5   :  { %3927 = vmatpush1.bf16.msk.msra.mxu0 %vm6228_vm10, %v6129_v40  ;;  %4119 = vmatpush1.bf16.msk.msra.mxu1 %vm6228_vm10, %v6129_v40 }
  0xf6   :  { %3929 = vmatprep.subr.msk.bf16.mxu0 %vm4977_vm1, %v6129_v40  ;;  %4121 = vmatprep.subr.msk.bf16.mxu1 %vm4977_vm1, %v6129_v40 }
  0xf9   :  { %3931 = vmatpush1.bf16.msk.msra.mxu0 %vm4993_vm0, %v6129_v40  ;;  %4123 = vmatpush1.bf16.msk.msra.mxu1 %vm4993_vm0, %v6129_v40 }
  0xfa   :  { %3933 = vmatprep.subr.bf16.mxu0 %v5352_v30  ;;  %4125 = vmatprep.subr.bf16.mxu1 %v5352_v30 }
  0xfc   :  { %2112 = vmatmul.mubr.f32.vlgmr.msra.gmra.mrb[2].mxu0 %v6246_v36  ;;  %2977 = vmatmul.mubr.f32.vlgmr.msra.gmra.mrb[2].mxu1 %v6247_v49 }
  0xfd   :  { %3935 = vmatpush1.bf16.msra.mxu0 %v5364_v62  ;;  %4127 = vmatpush1.bf16.msra.mxu1 %v5364_v62 }
  0xfe   :  { %3937 = vmatprep.subr.bf16.mxu0 %v5378_v19  ;;  %4129 = vmatprep.subr.bf16.mxu1 %v5378_v19 }
  0xff   :  { %2278 = vmatprep.mubr.f32.mxu0 %v6125_v18  ;;  %3143 = vmatprep.mubr.f32.mxu1 %v6125_v18 }
 0x101   :  { %3939 = vmatpush1.bf16.msra.mxu0 %v5390_v42  ;;  %4131 = vmatpush1.bf16.msra.mxu1 %v5390_v42 }
 0x102   :  { %3941 = vmatprep.subr.bf16.mxu0 %v5404_v52  ;;  %4133 = vmatprep.subr.bf16.mxu1 %v5404_v52 }
 0x105   :  { %3943 = vmatpush1.bf16.msra.mxu0 %v6248_v24  ;;  %4135 = vmatpush1.bf16.msra.mxu1 %v6248_v24 }
 0x106   :  { %3945 = vmatprep.subr.bf16.mxu0 %v5434_v34  ;;  %4137 = vmatprep.subr.bf16.mxu1 %v5434_v34 }
 0x109   :  { %3947 = vmatpush1.bf16.msra.mxu0 %v6249_v50  ;;  %4139 = vmatpush1.bf16.msra.mxu1 %v6249_v50 }
 0x10a   :  { %3949 = vmatprep.subr.bf16.mxu0 %v5462_v32  ;;  %4141 = vmatprep.subr.bf16.mxu1 %v5462_v32 }
 0x10d   :  { %3951 = vmatpush1.bf16.msra.mxu0 %v5474_v58  ;;  %4143 = vmatpush1.bf16.msra.mxu1 %v5474_v58 }
 0x10e   :  { %3953 = vmatprep.subr.bf16.mxu0 %v6250_v45  ;;  %4145 = vmatprep.subr.bf16.mxu1 %v6250_v45 }
 0x111   :  { %3955 = vmatpush1.bf16.msra.mxu0 %v5504_v5  ;;  %4147 = vmatpush1.bf16.msra.mxu1 %v5504_v5 }
 0x112   :  { %3957 = vmatprep.subr.bf16.mxu0 %v6251_v14  ;;  %4149 = vmatprep.subr.bf16.mxu1 %v6251_v14 }
 0x115   :  { %3959 = vmatpush1.bf16.msra.mxu0 %v6252_v3  ;;  %4151 = vmatpush1.bf16.msra.mxu1 %v6252_v3 }
 0x116   :  { %3961 = vmatprep.subr.bf16.mxu0 %v5548_v46  ;;  %4153 = vmatprep.subr.bf16.mxu1 %v5548_v46 }
 0x119   :  { %3963 = vmatpush1.bf16.msra.mxu0 %v5560_v21  ;;  %4155 = vmatpush1.bf16.msra.mxu1 %v5560_v21 }
 0x11a   :  { %3965 = vmatprep.subr.msk.bf16.mxu0 %vm6172_vm5, %v6129_v40  ;;  %4157 = vmatprep.subr.msk.bf16.mxu1 %vm6172_vm5, %v6129_v40 }
 0x11c   :  { %2280 = vmatmul.mubr.f32.vlgmr.msra.gmra.mrb[2].mxu0 %v5448_v53  ;;  %3145 = vmatmul.mubr.f32.vlgmr.msra.gmra.mrb[2].mxu1 %v5450_v51 }
 0x11d   :  { %3967 = vmatpush1.bf16.msk.msra.mxu0 %vm6176_vm6, %v6129_v40  ;;  %4159 = vmatpush1.bf16.msk.msra.mxu1 %vm6176_vm6, %v6129_v40 }
 0x11e   :  { %3969 = vmatprep.subr.msk.bf16.mxu0 %vm6180_vm9, %v6129_v40  ;;  %4161 = vmatprep.subr.msk.bf16.mxu1 %vm6180_vm9, %v6129_v40 }
 0x11f   :  { %2382 = vmatprep.mubr.f32.mxu0 %v6125_v18  ;;  %3247 = vmatprep.mubr.f32.mxu1 %v6125_v18 }
 0x121   :  { %3971 = vmatpush1.bf16.msk.msra.mxu0 %vm6184_vm12, %v6129_v40  ;;  %4163 = vmatpush1.bf16.msk.msra.mxu1 %vm6184_vm12, %v6129_v40 }
 0x122   :  { %3973 = vmatprep.subr.msk.bf16.mxu0 %vm6188_vm15, %v6129_v40  ;;  %4165 = vmatprep.subr.msk.bf16.mxu1 %vm6188_vm15, %v6129_v40 }
 0x125   :  { %3975 = vmatpush1.bf16.msk.msra.mxu0 %vm6193_vm2, %v6129_v40  ;;  %4167 = vmatpush1.bf16.msk.msra.mxu1 %vm6193_vm2, %v6129_v40 }
 0x126   :  { %3977 = vmatprep.subr.msk.bf16.mxu0 %vm6197_vm7, %v6129_v40  ;;  %4169 = vmatprep.subr.msk.bf16.mxu1 %vm6197_vm7, %v6129_v40 }
 0x129   :  { %3979 = vmatpush1.bf16.msk.msra.mxu0 %vm6202_vm11, %v6129_v40  ;;  %4171 = vmatpush1.bf16.msk.msra.mxu1 %vm6202_vm11, %v6129_v40 }
 0x12a   :  { %3981 = vmatprep.subr.msk.bf16.mxu0 %vm4822_vm4, %v6129_v40  ;;  %4173 = vmatprep.subr.msk.bf16.mxu1 %vm4822_vm4, %v6129_v40 }
 0x12d   :  { %3983 = vmatpush1.bf16.msk.msra.mxu0 %vm6209_vm14, %v6129_v40  ;;  %4175 = vmatpush1.bf16.msk.msra.mxu1 %vm6209_vm14, %v6129_v40 }
 0x12e   :  { %3985 = vmatprep.subr.msk.bf16.mxu0 %vm6214_vm13, %v6129_v40  ;;  %4177 = vmatprep.subr.msk.bf16.mxu1 %vm6214_vm13, %v6129_v40 }
 0x131   :  { %3987 = vmatpush1.bf16.msk.msra.mxu0 %vm6218_vm3, %v6129_v40  ;;  %4179 = vmatpush1.bf16.msk.msra.mxu1 %vm6218_vm3, %v6129_v40 }
 0x132   :  { %3989 = vmatprep.subr.msk.bf16.mxu0 %vm4908_vm8, %v6129_v40  ;;  %4181 = vmatprep.subr.msk.bf16.mxu1 %vm4908_vm8, %v6129_v40 }
 0x135   :  { %3991 = vmatpush1.bf16.msk.msra.mxu0 %vm6228_vm10, %v6129_v40  ;;  %4183 = vmatpush1.bf16.msk.msra.mxu1 %vm6228_vm10, %v6129_v40 }
 0x136   :  { %3993 = vmatprep.subr.msk.bf16.mxu0 %vm4977_vm1, %v6129_v40  ;;  %4185 = vmatprep.subr.msk.bf16.mxu1 %vm4977_vm1, %v6129_v40 }
 0x139   :  { %3995 = vmatpush1.bf16.msk.msra.mxu0 %vm4993_vm0, %v6129_v40  ;;  %4187 = vmatpush1.bf16.msk.msra.mxu1 %vm4993_vm0, %v6129_v40 }
 0x13c   :  { %2384 = vmatmul.mubr.f32.vlgmr.msra.gmra.mrb[2].mxu0 %v5448_v53  ;;  %3249 = vmatmul.mubr.f32.vlgmr.msra.gmra.mrb[2].mxu1 %v5450_v51 }
 0x14f   :  { %v742_v18 = vpop.f32.mrb[0].mxu0  ;;  %v1404_v27 = vpop.f32.mrb[0].mxu1 }
 0x150   :  { %v749_v60 = vrot.slane %v742_v18, 4  ;;  %v1411_v61 = vrot.slane %v1404_v27, 4  ;;  %v744_v30 = vpop.f32.mrb[1].mxu0  ;;  %v1406_v62 = vpop.f32.mrb[1].mxu1 }
 0x151   :  { %v750_v54 = vrot.slane %v744_v30, 4  ;;  %v1412_v19 = vrot.slane %v1406_v62, 4 }
 0x152   :  { %753 = vst [vmem:[%s5924_s4 + $0x10] ss:$-12 sps:$4 sm:$0xf3] %v749_v60   ;;  %3380 = vst [vmem:[%s5924_s4 + $0x30] ss:$-12 sps:$4 sm:$0xf3] %v1411_v61  }
 0x153   :  { %754 = vst [vmem:[%s5924_s4 + $0x18] ss:$-12 sps:$4 sm:$0xf3] %v750_v54   ;;  %3381 = vst [vmem:[%s5924_s4 + $0x38] ss:$-12 sps:$4 sm:$0xf3] %v1412_v19  }
 0x20f   :  { %v2385_v40 = vpop.f32.mrb[2].mxu0  ;;  %v3250_v22 = vpop.f32.mrb[2].mxu1 }
 0x210   :  { %v2392_v42 = vrot.slane %v2385_v40, 6  ;;  %v3257_v29 = vrot.slane %v3250_v22, 6  ;;  %v2387_v52 = vpop.f32.mrb[3].mxu0  ;;  %v3252_v48 = vpop.f32.mrb[3].mxu1 }
 0x211   :  { %v2393_v53 = vrot.slane %v2387_v52, 6  ;;  %v3258_v35 = vrot.slane %v3252_v48, 6 }
 0x212   :  { %2396 = vst [vmem:[%s5924_s4 + $0x10] sm:$0x1c] %v2392_v42  ;;  %3610 = vst [vmem:[%s5924_s4 + $0x30] sm:$0x1c] %v3257_v29 }
 0x213   :  { %2397 = vst [vmem:[%s5924_s4 + $0x18] sm:$0x1c] %v2393_v53  ;;  %3611 = vst [vmem:[%s5924_s4 + $0x38] sm:$0x1c] %v3258_v35 }

</bundles_post_ra>
